<compile_context>
chip_gen: v6e
topology: v6e:2x2x1
jax: 0.10.0
libtpu: 0.0.40
codegen_flags: <defaults>
</compile_context>

<pallas_src>
import jax
import jax.numpy as jnp
from jax.experimental import pallas as pl
from jax.experimental.pallas import tpu as pltpu


def _round_up(x, m):
    return ((x + m - 1) // m) * m


def roi_head_kernel(x_ref, w6_ref, b6_ref, w7_ref, b7_ref, wp_ref, bp_ref,
                    out_ref, acc_ref):
    """K-tiled fc6 accumulation + fused fc7/relu + fused [cls|bbox] predictor."""
    k = pl.program_id(1)

    @pl.when(k == 0)
    def _():
        acc_ref[...] = jnp.zeros_like(acc_ref)

    # Partial fc6 contraction over this K tile (f32 accumulation on the MXU).
    acc_ref[...] += jnp.dot(x_ref[...], w6_ref[...],
                            preferred_element_type=jnp.float32)

    @pl.when(k == pl.num_programs(1) - 1)
    def _():
        h = jnp.maximum(acc_ref[...] + b6_ref[...], 0.0)              # fc6 + relu
        h = jnp.dot(h.astype(w7_ref.dtype), w7_ref[...],
                    preferred_element_type=jnp.float32) + b7_ref[...]  # fc7
        h = jnp.maximum(h, 0.0)                                        # relu
        # Single lane-dense matmul producing [cls_logits | bbox_deltas | pad].
        out_ref[...] = (jnp.dot(h.astype(wp_ref.dtype), wp_ref[...],
                                preferred_element_type=jnp.float32)
                        + bp_ref[...]).astype(out_ref.dtype)


def prepare_roi_head_weights(w6, b6, w7, b7, wc, bc, wb, bb, *, tk=2048):
    """One-time weight prep (hoisted out of the per-call hot path).

    Weights come in (in_features, out_features) layout.  Returns a dict of
    device-ready arrays (bf16 matmul operands, f32 biases) plus tiling meta.
    """
    f, hidden = w6.shape
    assert hidden % 128 == 0, "representation_size must be a multiple of 128"
    assert w7.shape == (hidden, hidden)
    c, c4 = wc.shape[1], wb.shape[1]
    width = c + c4
    width_pad = _round_up(width, 128)          # lane-dense fused predictor output
    tk = min(tk, _round_up(f, 128))            # K tile (multiple of 128 lanes)
    f_pad = _round_up(f, tk)                   # zero-pad the contraction dim

    w6p = jnp.pad(w6, ((0, f_pad - f), (0, 0))).astype(jnp.bfloat16)
    w7p = w7.astype(jnp.bfloat16)
    wp = jnp.pad(jnp.concatenate([wc, wb], axis=1),
                 ((0, 0), (0, width_pad - width))).astype(jnp.bfloat16)
    b6f = jnp.reshape(b6, (1, hidden)).astype(jnp.float32)
    b7f = jnp.reshape(b7, (1, hidden)).astype(jnp.float32)
    bp = jnp.pad(jnp.concatenate([jnp.reshape(bc, (1, -1)),
                                  jnp.reshape(bb, (1, -1))], axis=1),
                 ((0, 0), (0, width_pad - width))).astype(jnp.float32)

    return dict(w6=w6p, b6=b6f, w7=w7p, b7=b7f, wp=wp, bp=bp,
                f=f, f_pad=f_pad, tk=tk, hidden=hidden,
                c=c, c4=c4, width_pad=width_pad)


def _vmem_limit_bytes(tn, tk, hidden, width_pad):
    bf16, f32 = 2, 4
    working = (2 * tn * tk * bf16                 # x tile (double-buffered)
               + 2 * tk * hidden * bf16           # w6 K-tile (double-buffered)
               + 2 * (hidden * f32                # invariants (<= 2 buffers)
                      + hidden * hidden * bf16
                      + hidden * f32
                      + hidden * width_pad * bf16
                      + width_pad * f32)
               + 2 * tn * width_pad * f32         # out tile
               + tn * hidden * f32)               # accumulator scratch
    # Tight, computed limit (>= scoped default, well below v7x physical 64 MiB
    # at real sizes, capped below v5e/v6e physical 128 MiB).
    return int(min(max(32 << 20, working * 3 // 2 + (2 << 20)), 96 << 20))


def _build_roi_head_call(n_pad, tn, f_pad, tk, hidden, width_pad,
                         weight_buffering):
    inv_kw = {} if weight_buffering is None else dict(
        pipeline_mode=weight_buffering)
    inv = lambda i, k: (0, 0)

    return pl.pallas_call(
        roi_head_kernel,
        out_shape=jax.ShapeDtypeStruct((n_pad, width_pad), jnp.float32),
        grid_spec=pltpu.PrefetchScalarGridSpec(
            num_scalar_prefetch=0,
            grid=(n_pad // tn, f_pad // tk),          # ROI outer, K inner
            in_specs=[
                pl.BlockSpec((tn, tk), lambda i, k: (i, k)),       # x tile
                pl.BlockSpec((tk, hidden), lambda i, k: (k, 0)),   # fc6 W tile
                pl.BlockSpec((1, hidden), inv, **inv_kw),          # fc6 bias
                pl.BlockSpec((hidden, hidden), inv, **inv_kw),     # fc7 W
                pl.BlockSpec((1, hidden), inv, **inv_kw),          # fc7 bias
                pl.BlockSpec((hidden, width_pad), inv, **inv_kw),  # [cls|bbox] W
                pl.BlockSpec((1, width_pad), inv, **inv_kw),       # fused bias
            ],
            out_specs=pl.BlockSpec((tn, width_pad), lambda i, k: (i, 0)),
            scratch_shapes=[pltpu.VMEM((tn, hidden), jnp.float32)],
        ),
        compiler_params=pltpu.CompilerParams(
            dimension_semantics=("parallel", "arbitrary"),
            vmem_limit_bytes=_vmem_limit_bytes(tn, tk, hidden, width_pad)),
    )


def roi_box_head(x, params, *, tn=256):
    """x: (N_roi, F) f32.  Returns (cls_logits (N, C), bbox_deltas (N, 4C))."""
    n, f = x.shape
    assert f == params["f"], "feature dim mismatch with prepared weights"
    tk, f_pad = params["tk"], params["f_pad"]
    hidden, width_pad = params["hidden"], params["width_pad"]

    # Adaptive ROI tile: small batches only pad to the bf16 sublane multiple.
    tn_eff = max(16, _round_up(n, 16)) if n <= tn else tn
    n_pad = _round_up(n, tn_eff)

    x_p = jnp.pad(x, ((0, n_pad - n), (0, f_pad - f))).astype(jnp.bfloat16)

    args = (x_p, params["w6"], params["b6"], params["w7"], params["b7"],
            params["wp"], params["bp"])
    try:
        out = _build_roi_head_call(n_pad, tn_eff, f_pad, tk, hidden, width_pad,
                                   pl.Buffered(1))(*args)
    except Exception:
        # Fallback: default double-buffering if single-buffer mode is rejected.
        out = _build_roi_head_call(n_pad, tn_eff, f_pad, tk, hidden, width_pad,
                                   None)(*args)

    c, c4 = params["c"], params["c4"]
    return out[:n, :c], out[:n, c:c + c4]


def _ref(x, w6, b6, w7, b7, wc, bc, wb, bb):
    h = jnp.maximum(x @ w6 + b6, 0.0)
    h = jnp.maximum(h @ w7 + b7, 0.0)
    return h @ wc + bc, h @ wb + bb


if __name__ == "__main__":
    # Small, module-consistent shapes:
    #   num_rois=16 ROIs, RoIAlign feat = 32 ch * 4*4 pool -> F=512 flattened,
    #   representation_size (fc6/fc7 hidden) = 256, num_classes = 5.
    num_rois, feat_dim, hidden, num_classes = 16, 512, 256, 5

    key = jax.random.PRNGKey(0)
    ks = jax.random.split(key, 9)
    scale = 0.02
    x = jax.random.normal(ks[0], (num_rois, feat_dim), jnp.float32)
    w6 = scale * jax.random.normal(ks[1], (feat_dim, hidden), jnp.float32)
    b6 = scale * jax.random.normal(ks[2], (1, hidden), jnp.float32)
    w7 = scale * jax.random.normal(ks[3], (hidden, hidden), jnp.float32)
    b7 = scale * jax.random.normal(ks[4], (1, hidden), jnp.float32)
    wc = scale * jax.random.normal(ks[5], (hidden, num_classes), jnp.float32)
    bc = scale * jax.random.normal(ks[6], (1, num_classes), jnp.float32)
    wb = scale * jax.random.normal(ks[7], (hidden, 4 * num_classes), jnp.float32)
    bb = scale * jax.random.normal(ks[8], (1, 4 * num_classes), jnp.float32)

    # One-time weight prep (reused across calls in real serving).
    params = prepare_roi_head_weights(w6, b6, w7, b7, wc, bc, wb, bb)
    jax.block_until_ready(params)

    cls_logits, bbox_deltas = roi_box_head(x, params)
    jax.block_until_ready((cls_logits, bbox_deltas))

    ref_cls, ref_bbox = _ref(x, w6, b6, w7, b7, wc, bc, wb, bb)
    # bf16 matmul operands (f32 accumulation) -> looser tolerance vs f32 ref.
    assert cls_logits.shape == ref_cls.shape and bbox_deltas.shape == ref_bbox.shape
    assert jnp.allclose(cls_logits, ref_cls, atol=3e-2, rtol=3e-2)
    assert jnp.allclose(bbox_deltas, ref_bbox, atol=3e-2, rtol=3e-2)

    print("KERNEL_OK")
</pallas_src>

<mosaic_0001>
module attributes {stable_mosaic.version = 11 : i64} {
  func.func @roi_head_kernel(%arg0: i32, %arg1: i32, %arg2: memref<16x512xbf16, #tpu.memory_space<vmem>>, %arg3: memref<512x256xbf16, #tpu.memory_space<vmem>>, %arg4: memref<1x256xf32, #tpu.memory_space<vmem>>, %arg5: memref<256x256xbf16, #tpu.memory_space<vmem>>, %arg6: memref<1x256xf32, #tpu.memory_space<vmem>>, %arg7: memref<256x128xbf16, #tpu.memory_space<vmem>>, %arg8: memref<1x128xf32, #tpu.memory_space<vmem>>, %arg9: memref<16x128xf32, #tpu.memory_space<vmem>>, %arg10: memref<16x256xf32, #tpu.memory_space<vmem>>) attributes {dimension_semantics = [#tpu.dimension_semantics<parallel>, #tpu.dimension_semantics<arbitrary>], iteration_bounds = array<i64: 1, 1>, scalar_prefetch = 0 : i64, scratch_operands = 1 : i64, tpu.core_type = #tpu.core_type<tc>, window_params = [{transform_indices = @transform_0, window_bounds = array<i64: 16, 512>}, {transform_indices = @transform_1, window_bounds = array<i64: 512, 256>}, {pipeline_mode = #tpu.pipeline_mode<synchronous>, transform_indices = @transform_2, window_bounds = array<i64: 1, 256>}, {pipeline_mode = #tpu.pipeline_mode<synchronous>, transform_indices = @transform_3, window_bounds = array<i64: 256, 256>}, {pipeline_mode = #tpu.pipeline_mode<synchronous>, transform_indices = @transform_4, window_bounds = array<i64: 1, 256>}, {pipeline_mode = #tpu.pipeline_mode<synchronous>, transform_indices = @transform_5, window_bounds = array<i64: 256, 128>}, {pipeline_mode = #tpu.pipeline_mode<synchronous>, transform_indices = @transform_6, window_bounds = array<i64: 1, 128>}, {transform_indices = @transform_7, window_bounds = array<i64: 16, 128>}]} {
    %c0_i32 = arith.constant 0 : i32
    %0 = arith.cmpi eq, %arg1, %c0_i32 : i32
    %1 = arith.extui %0 : i1 to i32
    %c0_i32_0 = arith.constant 0 : i32
    %2 = arith.cmpi ne, %1, %c0_i32_0 : i32
    scf.if %2 {
      %cst_10 = arith.constant 0.000000e+00 : f32
      %12 = vector.broadcast %cst_10 : f32 to vector<16x256xf32>
      %c0_11 = arith.constant 0 : index
      %c0_12 = arith.constant 0 : index
      %13 = vector.load %arg10[%c0_11, %c0_12] : memref<16x256xf32, #tpu.memory_space<vmem>>, vector<16x256xf32>
      tpu.vector_store %arg10[%c0_11, %c0_12], %12 {strides = array<i32>} : memref<16x256xf32, #tpu.memory_space<vmem>>, vector<16x256xf32>,
    } else {
    }
    %c0 = arith.constant 0 : index
    %c0_1 = arith.constant 0 : index
    %3 = vector.load %arg10[%c0, %c0_1] : memref<16x256xf32, #tpu.memory_space<vmem>>, vector<16x256xf32>
    %c0_2 = arith.constant 0 : index
    %c0_3 = arith.constant 0 : index
    %4 = vector.load %arg2[%c0_2, %c0_3] : memref<16x512xbf16, #tpu.memory_space<vmem>>, vector<16x512xbf16>
    %c0_4 = arith.constant 0 : index
    %c0_5 = arith.constant 0 : index
    %5 = vector.load %arg3[%c0_4, %c0_5] : memref<512x256xbf16, #tpu.memory_space<vmem>>, vector<512x256xbf16>
    %cst = arith.constant dense<0.000000e+00> : vector<16x256xf32>
    %6 = tpu.matmul %4, %5, %cst {dimension_numbers = #tpu.dot_dimension_numbers<[1], [0], [0], [1], [0, 0, 1, 1], [], []>} : vector<16x512xbf16>, vector<512x256xbf16>, vector<16x256xf32> -> vector<16x256xf32>
    %7 = arith.addf %3, %6 : vector<16x256xf32>
    %c0_6 = arith.constant 0 : index
    %c0_7 = arith.constant 0 : index
    %8 = vector.load %arg10[%c0_6, %c0_7] : memref<16x256xf32, #tpu.memory_space<vmem>>, vector<16x256xf32>
    tpu.vector_store %arg10[%c0_6, %c0_7], %7 {strides = array<i32>} : memref<16x256xf32, #tpu.memory_space<vmem>>, vector<16x256xf32>,
    %c0_i32_8 = arith.constant 0 : i32
    %9 = arith.cmpi eq, %arg1, %c0_i32_8 : i32
    %10 = arith.extui %9 : i1 to i32
    %c0_i32_9 = arith.constant 0 : i32
    %11 = arith.cmpi ne, %10, %c0_i32_9 : i32
    scf.if %11 {
      %c0_10 = arith.constant 0 : index
      %c0_11 = arith.constant 0 : index
      %12 = vector.load %arg10[%c0_10, %c0_11] : memref<16x256xf32, #tpu.memory_space<vmem>>, vector<16x256xf32>
      %c0_12 = arith.constant 0 : index
      %c0_13 = arith.constant 0 : index
      %13 = vector.load %arg4[%c0_12, %c0_13] : memref<1x256xf32, #tpu.memory_space<vmem>>, vector<1x256xf32>
      %14 = vector.broadcast %13 : vector<1x256xf32> to vector<16x256xf32>
      %15 = arith.addf %12, %14 : vector<16x256xf32>
      %cst_14 = arith.constant 0.000000e+00 : f32
      %16 = vector.broadcast %cst_14 : f32 to vector<16x256xf32>
      %17 = arith.maximumf %15, %16 : vector<16x256xf32>
      %18 = arith.truncf %17 : vector<16x256xf32> to vector<16x256xbf16>
      %c0_15 = arith.constant 0 : index
      %c0_16 = arith.constant 0 : index
      %19 = vector.load %arg5[%c0_15, %c0_16] : memref<256x256xbf16, #tpu.memory_space<vmem>>, vector<256x256xbf16>
      %cst_17 = arith.constant dense<0.000000e+00> : vector<16x256xf32>
      %20 = tpu.matmul %18, %19, %cst_17 {dimension_numbers = #tpu.dot_dimension_numbers<[1], [0], [0], [1], [0, 0, 1, 1], [], []>} : vector<16x256xbf16>, vector<256x256xbf16>, vector<16x256xf32> -> vector<16x256xf32>
      %c0_18 = arith.constant 0 : index
      %c0_19 = arith.constant 0 : index
      %21 = vector.load %arg6[%c0_18, %c0_19] : memref<1x256xf32, #tpu.memory_space<vmem>>, vector<1x256xf32>
      %22 = vector.broadcast %21 : vector<1x256xf32> to vector<16x256xf32>
      %23 = arith.addf %20, %22 : vector<16x256xf32>
      %cst_20 = arith.constant 0.000000e+00 : f32
      %24 = vector.broadcast %cst_20 : f32 to vector<16x256xf32>
      %25 = arith.maximumf %23, %24 : vector<16x256xf32>
      %26 = arith.truncf %25 : vector<16x256xf32> to vector<16x256xbf16>
      %c0_21 = arith.constant 0 : index
      %c0_22 = arith.constant 0 : index
      %27 = vector.load %arg7[%c0_21, %c0_22] : memref<256x128xbf16, #tpu.memory_space<vmem>>, vector<256x128xbf16>
      %cst_23 = arith.constant dense<0.000000e+00> : vector<16x128xf32>
      %28 = tpu.matmul %26, %27, %cst_23 {dimension_numbers = #tpu.dot_dimension_numbers<[1], [0], [0], [1], [0, 0, 1, 1], [], []>} : vector<16x256xbf16>, vector<256x128xbf16>, vector<16x128xf32> -> vector<16x128xf32>
      %c0_24 = arith.constant 0 : index
      %c0_25 = arith.constant 0 : index
      %29 = vector.load %arg8[%c0_24, %c0_25] : memref<1x128xf32, #tpu.memory_space<vmem>>, vector<1x128xf32>
      %30 = vector.broadcast %29 : vector<1x128xf32> to vector<16x128xf32>
      %31 = arith.addf %28, %30 : vector<16x128xf32>
      %c0_26 = arith.constant 0 : index
      %c0_27 = arith.constant 0 : index
      %32 = vector.load %arg9[%c0_26, %c0_27] : memref<16x128xf32, #tpu.memory_space<vmem>>, vector<16x128xf32>
      tpu.vector_store %arg9[%c0_26, %c0_27], %31 {strides = array<i32>} : memref<16x128xf32, #tpu.memory_space<vmem>>, vector<16x128xf32>,
    } else {
    }
    return
  }
  func.func @transform_0(%arg0: i32, %arg1: i32) -> (i32, i32) {
    %c0_i32 = arith.constant 0 : i32
    return %arg0, %arg1 : i32, i32
  }
  func.func @transform_1(%arg0: i32, %arg1: i32) -> (i32, i32) {
    %c0_i32 = arith.constant 0 : i32
    %c0_i32_0 = arith.constant 0 : i32
    return %arg1, %c0_i32 : i32, i32
  }
  func.func @transform_2(%arg0: i32, %arg1: i32) -> (i32, i32) {
    %c0_i32 = arith.constant 0 : i32
    %c0_i32_0 = arith.constant 0 : i32
    %c0_i32_1 = arith.constant 0 : i32
    return %c0_i32, %c0_i32_0 : i32, i32
  }
  func.func @transform_3(%arg0: i32, %arg1: i32) -> (i32, i32) {
    %c0_i32 = arith.constant 0 : i32
    %c0_i32_0 = arith.constant 0 : i32
    %c0_i32_1 = arith.constant 0 : i32
    return %c0_i32, %c0_i32_0 : i32, i32
  }
  func.func @transform_4(%arg0: i32, %arg1: i32) -> (i32, i32) {
    %c0_i32 = arith.constant 0 : i32
    %c0_i32_0 = arith.constant 0 : i32
    %c0_i32_1 = arith.constant 0 : i32
    return %c0_i32, %c0_i32_0 : i32, i32
  }
  func.func @transform_5(%arg0: i32, %arg1: i32) -> (i32, i32) {
    %c0_i32 = arith.constant 0 : i32
    %c0_i32_0 = arith.constant 0 : i32
    %c0_i32_1 = arith.constant 0 : i32
    return %c0_i32, %c0_i32_0 : i32, i32
  }
  func.func @transform_6(%arg0: i32, %arg1: i32) -> (i32, i32) {
    %c0_i32 = arith.constant 0 : i32
    %c0_i32_0 = arith.constant 0 : i32
    %c0_i32_1 = arith.constant 0 : i32
    return %c0_i32, %c0_i32_0 : i32, i32
  }
  func.func @transform_7(%arg0: i32, %arg1: i32) -> (i32, i32) {
    %c0_i32 = arith.constant 0 : i32
    %c0_i32_0 = arith.constant 0 : i32
    return %arg0, %c0_i32 : i32, i32
  }
}

module attributes {stable_mosaic.version = 11 : i64} {
  func.func @roi_head_kernel(%arg0: i32, %arg1: i32, %arg2: memref<16x512xbf16, #tpu.memory_space<vmem>>, %arg3: memref<512x256xbf16, #tpu.memory_space<vmem>>, %arg4: memref<1x256xf32, #tpu.memory_space<vmem>>, %arg5: memref<256x256xbf16, #tpu.memory_space<vmem>>, %arg6: memref<1x256xf32, #tpu.memory_space<vmem>>, %arg7: memref<256x128xbf16, #tpu.memory_space<vmem>>, %arg8: memref<1x128xf32, #tpu.memory_space<vmem>>, %arg9: memref<16x128xf32, #tpu.memory_space<vmem>>, %arg10: memref<16x256xf32, #tpu.memory_space<vmem>>) attributes {dimension_semantics = [#tpu.dimension_semantics<parallel>, #tpu.dimension_semantics<arbitrary>], iteration_bounds = array<i64: 1, 1>, scalar_prefetch = 0 : i64, scratch_operands = 1 : i64, tpu.core_type = #tpu.core_type<tc>, window_params = [{transform_indices = @transform_0, window_bounds = array<i64: 16, 512>}, {transform_indices = @transform_1, window_bounds = array<i64: 512, 256>}, {pipeline_mode = #tpu.pipeline_mode<synchronous>, transform_indices = @transform_2, window_bounds = array<i64: 1, 256>}, {pipeline_mode = #tpu.pipeline_mode<synchronous>, transform_indices = @transform_3, window_bounds = array<i64: 256, 256>}, {pipeline_mode = #tpu.pipeline_mode<synchronous>, transform_indices = @transform_4, window_bounds = array<i64: 1, 256>}, {pipeline_mode = #tpu.pipeline_mode<synchronous>, transform_indices = @transform_5, window_bounds = array<i64: 256, 128>}, {pipeline_mode = #tpu.pipeline_mode<synchronous>, transform_indices = @transform_6, window_bounds = array<i64: 1, 128>}, {transform_indices = @transform_7, window_bounds = array<i64: 16, 128>}]} {
    %c0_i32 = arith.constant 0 : i32
    %0 = arith.cmpi eq, %arg1, %c0_i32 : i32
    %1 = arith.extui %0 : i1 to i32
    %c0_i32_0 = arith.constant 0 : i32
    %2 = arith.cmpi ne, %1, %c0_i32_0 : i32
    scf.if %2 {
      %cst_10 = arith.constant 0.000000e+00 : f32
      %12 = vector.broadcast %cst_10 : f32 to vector<16x256xf32>
      %c0_11 = arith.constant 0 : index
      %c0_12 = arith.constant 0 : index
      %13 = vector.load %arg10[%c0_11, %c0_12] : memref<16x256xf32, #tpu.memory_space<vmem>>, vector<16x256xf32>
      tpu.vector_store %arg10[%c0_11, %c0_12], %12 {strides = array<i32>} : memref<16x256xf32, #tpu.memory_space<vmem>>, vector<16x256xf32>,
    } else {
    }
    %c0 = arith.constant 0 : index
    %c0_1 = arith.constant 0 : index
    %3 = vector.load %arg10[%c0, %c0_1] : memref<16x256xf32, #tpu.memory_space<vmem>>, vector<16x256xf32>
    %c0_2 = arith.constant 0 : index
    %c0_3 = arith.constant 0 : index
    %4 = vector.load %arg2[%c0_2, %c0_3] : memref<16x512xbf16, #tpu.memory_space<vmem>>, vector<16x512xbf16>
    %c0_4 = arith.constant 0 : index
    %c0_5 = arith.constant 0 : index
    %5 = vector.load %arg3[%c0_4, %c0_5] : memref<512x256xbf16, #tpu.memory_space<vmem>>, vector<512x256xbf16>
    %cst = arith.constant dense<0.000000e+00> : vector<16x256xf32>
    %6 = tpu.matmul %4, %5, %cst {dimension_numbers = #tpu.dot_dimension_numbers<[1], [0], [0], [1], [0, 0, 1, 1], [], []>} : vector<16x512xbf16>, vector<512x256xbf16>, vector<16x256xf32> -> vector<16x256xf32>
    %7 = arith.addf %3, %6 : vector<16x256xf32>
    %c0_6 = arith.constant 0 : index
    %c0_7 = arith.constant 0 : index
    %8 = vector.load %arg10[%c0_6, %c0_7] : memref<16x256xf32, #tpu.memory_space<vmem>>, vector<16x256xf32>
    tpu.vector_store %arg10[%c0_6, %c0_7], %7 {strides = array<i32>} : memref<16x256xf32, #tpu.memory_space<vmem>>, vector<16x256xf32>,
    %c0_i32_8 = arith.constant 0 : i32
    %9 = arith.cmpi eq, %arg1, %c0_i32_8 : i32
    %10 = arith.extui %9 : i1 to i32
    %c0_i32_9 = arith.constant 0 : i32
    %11 = arith.cmpi ne, %10, %c0_i32_9 : i32
    scf.if %11 {
      %c0_10 = arith.constant 0 : index
      %c0_11 = arith.constant 0 : index
      %12 = vector.load %arg10[%c0_10, %c0_11] : memref<16x256xf32, #tpu.memory_space<vmem>>, vector<16x256xf32>
      %c0_12 = arith.constant 0 : index
      %c0_13 = arith.constant 0 : index
      %13 = vector.load %arg4[%c0_12, %c0_13] : memref<1x256xf32, #tpu.memory_space<vmem>>, vector<1x256xf32>
      %14 = vector.broadcast %13 : vector<1x256xf32> to vector<16x256xf32>
      %15 = arith.addf %12, %14 : vector<16x256xf32>
      %cst_14 = arith.constant 0.000000e+00 : f32
      %16 = vector.broadcast %cst_14 : f32 to vector<16x256xf32>
      %17 = arith.maximumf %15, %16 : vector<16x256xf32>
      %18 = arith.truncf %17 : vector<16x256xf32> to vector<16x256xbf16>
      %c0_15 = arith.constant 0 : index
      %c0_16 = arith.constant 0 : index
      %19 = vector.load %arg5[%c0_15, %c0_16] : memref<256x256xbf16, #tpu.memory_space<vmem>>, vector<256x256xbf16>
      %cst_17 = arith.constant dense<0.000000e+00> : vector<16x256xf32>
      %20 = tpu.matmul %18, %19, %cst_17 {dimension_numbers = #tpu.dot_dimension_numbers<[1], [0], [0], [1], [0, 0, 1, 1], [], []>} : vector<16x256xbf16>, vector<256x256xbf16>, vector<16x256xf32> -> vector<16x256xf32>
      %c0_18 = arith.constant 0 : index
      %c0_19 = arith.constant 0 : index
      %21 = vector.load %arg6[%c0_18, %c0_19] : memref<1x256xf32, #tpu.memory_space<vmem>>, vector<1x256xf32>
      %22 = vector.broadcast %21 : vector<1x256xf32> to vector<16x256xf32>
      %23 = arith.addf %20, %22 : vector<16x256xf32>
      %cst_20 = arith.constant 0.000000e+00 : f32
      %24 = vector.broadcast %cst_20 : f32 to vector<16x256xf32>
      %25 = arith.maximumf %23, %24 : vector<16x256xf32>
      %26 = arith.truncf %25 : vector<16x256xf32> to vector<16x256xbf16>
      %c0_21 = arith.constant 0 : index
      %c0_22 = arith.constant 0 : index
      %27 = vector.load %arg7[%c0_21, %c0_22] : memref<256x128xbf16, #tpu.memory_space<vmem>>, vector<256x128xbf16>
      %cst_23 = arith.constant dense<0.000000e+00> : vector<16x128xf32>
      %28 = tpu.matmul %26, %27, %cst_23 {dimension_numbers = #tpu.dot_dimension_numbers<[1], [0], [0], [1], [0, 0, 1, 1], [], []>} : vector<16x256xbf16>, vector<256x128xbf16>, vector<16x128xf32> -> vector<16x128xf32>
      %c0_24 = arith.constant 0 : index
      %c0_25 = arith.constant 0 : index
      %29 = vector.load %arg8[%c0_24, %c0_25] : memref<1x128xf32, #tpu.memory_space<vmem>>, vector<1x128xf32>
      %30 = vector.broadcast %29 : vector<1x128xf32> to vector<16x128xf32>
      %31 = arith.addf %28, %30 : vector<16x128xf32>
      %c0_26 = arith.constant 0 : index
      %c0_27 = arith.constant 0 : index
      %32 = vector.load %arg9[%c0_26, %c0_27] : memref<16x128xf32, #tpu.memory_space<vmem>>, vector<16x128xf32>
      tpu.vector_store %arg9[%c0_26, %c0_27], %31 {strides = array<i32>} : memref<16x128xf32, #tpu.memory_space<vmem>>, vector<16x128xf32>,
    } else {
    }
    return
  }
  func.func @transform_0(%arg0: i32, %arg1: i32) -> (i32, i32) {
    %c0_i32 = arith.constant 0 : i32
    return %arg0, %arg1 : i32, i32
  }
  func.func @transform_1(%arg0: i32, %arg1: i32) -> (i32, i32) {
    %c0_i32 = arith.constant 0 : i32
    %c0_i32_0 = arith.constant 0 : i32
    return %arg1, %c0_i32 : i32, i32
  }
  func.func @transform_2(%arg0: i32, %arg1: i32) -> (i32, i32) {
    %c0_i32 = arith.constant 0 : i32
    %c0_i32_0 = arith.constant 0 : i32
    %c0_i32_1 = arith.constant 0 : i32
    return %c0_i32, %c0_i32_0 : i32, i32
  }
  func.func @transform_3(%arg0: i32, %arg1: i32) -> (i32, i32) {
    %c0_i32 = arith.constant 0 : i32
    %c0_i32_0 = arith.constant 0 : i32
    %c0_i32_1 = arith.constant 0 : i32
    return %c0_i32, %c0_i32_0 : i32, i32
  }
  func.func @transform_4(%arg0: i32, %arg1: i32) -> (i32, i32) {
    %c0_i32 = arith.constant 0 : i32
    %c0_i32_0 = arith.constant 0 : i32
    %c0_i32_1 = arith.constant 0 : i32
    return %c0_i32, %c0_i32_0 : i32, i32
  }
  func.func @transform_5(%arg0: i32, %arg1: i32) -> (i32, i32) {
    %c0_i32 = arith.constant 0 : i32
    %c0_i32_0 = arith.constant 0 : i32
    %c0_i32_1 = arith.constant 0 : i32
    return %c0_i32, %c0_i32_0 : i32, i32
  }
  func.func @transform_6(%arg0: i32, %arg1: i32) -> (i32, i32) {
    %c0_i32 = arith.constant 0 : i32
    %c0_i32_0 = arith.constant 0 : i32
    %c0_i32_1 = arith.constant 0 : i32
    return %c0_i32, %c0_i32_0 : i32, i32
  }
  func.func @transform_7(%arg0: i32, %arg1: i32) -> (i32, i32) {
    %c0_i32 = arith.constant 0 : i32
    %c0_i32_0 = arith.constant 0 : i32
    return %arg0, %c0_i32 : i32, i32
  }
}

</mosaic_0001>

<bundles_post_ra>
// kernel: tpu_custom_call.1
= control target key start
LH: loop header
LB: loop body
LE: loop exit
PB: predicated region body
PF: predicated region fallthrough
CT: control target
= control target key end

     0   :  { %12 = vsyncpa [#allocation4], 0  ;;  %s1584_s0 = inlined_call_operand.hbm [shape: bf16[16,512], index: 0, kind: input, shape index: {}]   ;;  %s1585_s1 = inlined_call_operand.hbm [shape: bf16[512,256], index: 1, kind: input, shape index: {}]   ;;  %s1586_s2 = inlined_call_operand.vmem [shape: f32[1,256], index: 2, kind: input, shape index: {}]   ;;  %s1587_s3 = inlined_call_operand.hbm [shape: bf16[256,256], index: 3, kind: input, shape index: {}]   ;;  %s1588_s4 = inlined_call_operand.vmem [shape: f32[1,256], index: 4, kind: input, shape index: {}]   ;;  %s1589_s5 = inlined_call_operand.hbm [shape: bf16[256,128], index: 5, kind: input, shape index: {}]   ;;  %s1590_s6 = inlined_call_operand.vmem [shape: f32[1,128], index: 6, kind: input, shape index: {}]   ;;  %s1591_s7 = inlined_call_operand.hbm [shape: f32[16,128], index: 7, kind: output, shape index: {}]  }
   0x1   :  { %13 = vsyncpa [#allocation7], 0 }
   0x2   :  { %14 = vsyncpa [#allocation10], 0 }
   0x3   :  { %15 = vsyncpa [#allocation5], 0  ;;  %s1500_s24 = smov [#allocation6]  }
   0x4   :  { %s33_s25 = sshll.u32 %s1500_s24, 4  ;;  %s34_s25 = int_to_ptr.vmem [resolvable:$true] %s33_s25 }
   0x5   :  { %s1400_s26 = scalar_lea.vmem %s34_s25, 8192  ;;  %p1405_p1 = scmp.lt.s32.totalorder %s34_s25, %s34_s25 }
   0x6   :  { %p1401_p0 = scmp.ne.s32.totalorder %s34_s25, %s1400_s26  ;;  %p1406_p2 = scmp.lt.s32.totalorder %s1400_s26, %s1400_s26 }
   0x8   :  { %p1407_p3 = por %p1406_p2, %p1405_p1 }
   0xa   :  { %p1408_p4 = pnand %p1407_p3, %p1401_p0 }
   0xc   :  { %1411 = shalt.err (!%p1408_p4)
}
   0xd   :  { %s1501_s27 = smov 128   ;;  %s1502_s28 = smov 8  }
   0xe   :  { %39 = dma.hbm_to_vmem [thread:$0]  %s1585_s1, 8192, %s34_s25, [#allocation7], %s1501_s27, %s1501_s27, %s1502_s28  }
   0xf   :  { %s1503_s8 = smov [#allocation3]  }
  0x10   :  { %s21_s9 = sshll.u32 %s1503_s8, 4  ;;  %s22_s9 = int_to_ptr.vmem [resolvable:$true] %s21_s9 }
  0x11   :  { %s1420_s10 = scalar_lea.vmem %s22_s9, 512  ;;  %p1425_p6 = scmp.lt.s32.totalorder %s22_s9, %s22_s9 }
  0x12   :  { %p1421_p5 = scmp.ne.s32.totalorder %s22_s9, %s1420_s10  ;;  %p1426_p7 = scmp.lt.s32.totalorder %s1420_s10, %s1420_s10 }
  0x14   :  { %p1427_p8 = por %p1426_p7, %p1425_p6 }
  0x16   :  { %p1428_p9 = pnand %p1427_p8, %p1421_p5 }
  0x18   :  { %1431 = shalt.err (!%p1428_p9)
}
  0x19   :  { %s1504_s11 = smov 256   ;;  %s1505_s12 = smov 16  }
  0x1a   :  { %27 = dma.hbm_to_vmem [thread:$0]  %s1584_s0, 512, %s22_s9, [#allocation4], %s1504_s11, %s1504_s11, %s1505_s12  }
  0x1b   :  { %s1506_s15 = smov [#allocation8]   ;;  %s1507_s17 = smov [#allocation9]  }
  0x1c   :  { %s47_s16 = sshll.u32 %s1506_s15, 4  ;;  %s61_s1 = sshll.u32 %s1507_s17, 4  ;;  %s48_s16 = int_to_ptr.vmem [resolvable:$true] %s47_s16  ;;  %s62_s1 = int_to_ptr.vmem [resolvable:$true] %s61_s1 }
  0x1d   :  { %s1440_s18 = scalar_lea.vmem %s48_s16, 4096  ;;  %p1445_p11 = scmp.lt.s32.totalorder %s48_s16, %s48_s16 }
  0x1e   :  { %p1441_p10 = scmp.ne.s32.totalorder %s48_s16, %s1440_s18  ;;  %p1446_p12 = scmp.lt.s32.totalorder %s1440_s18, %s1440_s18 }
  0x20   :  { %p1447_p13 = por %p1446_p12, %p1445_p11 }
  0x22   :  { %p1448_p0 = pnand %p1447_p13, %p1441_p10 }
  0x24   :  { %1451 = shalt.err (!%p1448_p0)
}
  0x25   :  { %53 = dma.hbm_to_vmem [thread:$0]  %s1587_s3, 4096, %s48_s16, [#allocation7], %s1501_s27, %s1501_s27, %s1502_s28  }
  0x26   :  { %s1460_s0 = scalar_lea.vmem %s62_s1, 2048  ;;  %p1465_p2 = scmp.lt.s32.totalorder %s62_s1, %s62_s1 }
  0x27   :  { %p1461_p1 = scmp.ne.s32.totalorder %s62_s1, %s1460_s0  ;;  %p1466_p3 = scmp.lt.s32.totalorder %s1460_s0, %s1460_s0 }
  0x29   :  { %p1467_p4 = por %p1466_p3, %p1465_p2 }
  0x2b   :  { %p1468_p5 = pnand %p1467_p4, %p1461_p1 }
  0x2d   :  { %1471 = shalt.err (!%p1468_p5)
}
  0x2e   :  { %s1508_s21 = smov 64   ;;  %s1509_s22 = smov 4  }
  0x2f   :  { %67 = dma.hbm_to_vmem [thread:$0]  %s1589_s5, 2048, %s62_s1, [#allocation10], %s1508_s21, %s1508_s21, %s1509_s22  }
  0x30   :  { %1492 = dma.done.wait [#allocation4], 512  }
  0x31   :  { %1493 = vsyncadd [#allocation4], 4294966784 }
  0x32   :  { %1494 = dma.done.wait [#allocation7], 12288  }
  0x33   :  { %1495 = vsyncadd [#allocation7], 4294955008 }
  0x34   :  { %1496 = dma.done.wait [#allocation10], 2048  }
  0x35   :  { %1497 = vsyncadd [#allocation10], 4294965248  ;;  %v1226_v0 = vld [vmem:[#allocation6 + $0x74] ss:$8 sps:$4 sm:$0xff]   ;;  %v1230_v2 = vld [vmem:[#allocation6 + $0x70] ss:$8 sps:$4 sm:$0xff]  }
  0x36   :  { %v1228_v1 = vld [vmem:[#allocation6 + $0x174] ss:$8 sps:$4 sm:$0xff]   ;;  %503 = vmatprep.subr.bf16.mxu0 %v1226_v0  ;;  %v1231_v3 = vld [vmem:[#allocation6 + $0x170] ss:$8 sps:$4 sm:$0xff]   ;;  %v1232_v4 = vld [vmem:[#allocation6 + $0x64] ss:$8 sps:$4 sm:$0xff]  }
  0x37   :  { %546 = vmatprep.subr.bf16.mxu1 %v1228_v1  ;;  %504 = vmatpush1.bf16.msra.mxu0 %v1230_v2  ;;  %v1234_v5 = vld [vmem:[#allocation6 + $0x164] ss:$8 sps:$4 sm:$0xff]   ;;  %v1236_v6 = vld [vmem:[#allocation6 + $0x60] ss:$8 sps:$4 sm:$0xff]   ;;  %v1238_v8 = vld [vmem:[#allocation6 + $0x54] ss:$8 sps:$4 sm:$0xff]  }
  0x38   :  { %547 = vmatpush1.bf16.msra.mxu1 %v1231_v3  ;;  %505 = vmatprep.subr.bf16.mxu0 %v1232_v4  ;;  %v1237_v7 = vld [vmem:[#allocation6 + $0x160] ss:$8 sps:$4 sm:$0xff]   ;;  %v1240_v9 = vld [vmem:[#allocation6 + $0x154] ss:$8 sps:$4 sm:$0xff]   ;;  %v1242_v10 = vld [vmem:[#allocation6 + $0x50] ss:$8 sps:$4 sm:$0xff]  }
  0x39   :  { %548 = vmatprep.subr.bf16.mxu1 %v1234_v5  ;;  %v1243_v11 = vld [vmem:[#allocation6 + $0x150] ss:$8 sps:$4 sm:$0xff]   ;;  %v1244_v12 = vld [vmem:[#allocation6 + $0x44] ss:$8 sps:$4 sm:$0xff]   ;;  %v1248_v14 = vld [vmem:[#allocation6 + $0x40] ss:$8 sps:$4 sm:$0xff]  }
  0x3a   :  { %v1246_v13 = vld [vmem:[#allocation6 + $0x144] ss:$8 sps:$4 sm:$0xff]   ;;  %v1249_v15 = vld [vmem:[#allocation6 + $0x140] ss:$8 sps:$4 sm:$0xff]   ;;  %v1250_v16 = vld [vmem:[#allocation6 + $0x34] ss:$8 sps:$4 sm:$0xff]  }
  0x3b   :  { %506 = vmatpush1.bf16.msra.mxu0 %v1236_v6  ;;  %v1252_v17 = vld [vmem:[#allocation6 + $0x134] ss:$8 sps:$4 sm:$0xff]   ;;  %v1254_v18 = vld [vmem:[#allocation6 + $0x30] ss:$8 sps:$4 sm:$0xff]   ;;  %v1256_v20 = vld [vmem:[#allocation6 + $0x24] ss:$8 sps:$4 sm:$0xff]  }
  0x3c   :  { %549 = vmatpush1.bf16.msra.mxu1 %v1237_v7  ;;  %507 = vmatprep.subr.bf16.mxu0 %v1238_v8  ;;  %v1255_v19 = vld [vmem:[#allocation6 + $0x130] ss:$8 sps:$4 sm:$0xff]   ;;  %v1258_v21 = vld [vmem:[#allocation6 + $0x124] ss:$8 sps:$4 sm:$0xff]   ;;  %v1260_v22 = vld [vmem:[#allocation6 + $0x20] ss:$8 sps:$4 sm:$0xff]  }
  0x3d   :  { %550 = vmatprep.subr.bf16.mxu1 %v1240_v9  ;;  %v1261_v23 = vld [vmem:[#allocation6 + $0x120] ss:$8 sps:$4 sm:$0xff]   ;;  %v1262_v24 = vld [vmem:[#allocation6 + $0x14] ss:$8 sps:$4 sm:$0xff]   ;;  %v1266_v26 = vld [vmem:[#allocation6 + $0x10] ss:$8 sps:$4 sm:$0xff]  }
  0x3e   :  { %v1264_v25 = vld [vmem:[#allocation6 + $0x114] ss:$8 sps:$4 sm:$0xff]   ;;  %v1267_v27 = vld [vmem:[#allocation6 + $0x110] ss:$8 sps:$4 sm:$0xff]   ;;  %v1268_v28 = vld [vmem:[#allocation6 + $0x4] ss:$8 sps:$4 sm:$0xff]  }
  0x3f   :  { %508 = vmatpush1.bf16.msra.mxu0 %v1242_v10  ;;  %v1270_v29 = vld [vmem:[#allocation6 + $0x104] ss:$8 sps:$4 sm:$0xff]   ;;  %v1272_v30 = vld [vmem:[#allocation6] ss:$8 sps:$4 sm:$0xff]   ;;  %v1274_v32 = vld [vmem:[#allocation6 + $0xf4] ss:$8 sps:$4 sm:$0xff]  }
  0x40   :  { %551 = vmatpush1.bf16.msra.mxu1 %v1243_v11  ;;  %509 = vmatprep.subr.bf16.mxu0 %v1244_v12  ;;  %v1273_v31 = vld [vmem:[#allocation6 + $0x100] ss:$8 sps:$4 sm:$0xff]   ;;  %v1276_v33 = vld [vmem:[#allocation6 + $0x1f4] ss:$8 sps:$4 sm:$0xff]   ;;  %v1278_v34 = vld [vmem:[#allocation6 + $0xf0] ss:$8 sps:$4 sm:$0xff]  }
  0x41   :  { %552 = vmatprep.subr.bf16.mxu1 %v1246_v13  ;;  %v1279_v35 = vld [vmem:[#allocation6 + $0x1f0] ss:$8 sps:$4 sm:$0xff]   ;;  %v1280_v36 = vld [vmem:[#allocation6 + $0xe4] ss:$8 sps:$4 sm:$0xff]   ;;  %v1284_v38 = vld [vmem:[#allocation6 + $0xe0] ss:$8 sps:$4 sm:$0xff]  }
  0x42   :  { %v1282_v37 = vld [vmem:[#allocation6 + $0x1e4] ss:$8 sps:$4 sm:$0xff]   ;;  %v1285_v39 = vld [vmem:[#allocation6 + $0x1e0] ss:$8 sps:$4 sm:$0xff]   ;;  %v1286_v40 = vld [vmem:[#allocation6 + $0xd4] ss:$8 sps:$4 sm:$0xff]  }
  0x43   :  { %510 = vmatpush1.bf16.msra.mxu0 %v1248_v14  ;;  %v1288_v41 = vld [vmem:[#allocation6 + $0x1d4] ss:$8 sps:$4 sm:$0xff]   ;;  %v1290_v42 = vld [vmem:[#allocation6 + $0xd0] ss:$8 sps:$4 sm:$0xff]   ;;  %v1292_v44 = vld [vmem:[#allocation6 + $0xc4] ss:$8 sps:$4 sm:$0xff]  }
  0x44   :  { %553 = vmatpush1.bf16.msra.mxu1 %v1249_v15  ;;  %511 = vmatprep.subr.bf16.mxu0 %v1250_v16  ;;  %v1291_v43 = vld [vmem:[#allocation6 + $0x1d0] ss:$8 sps:$4 sm:$0xff]   ;;  %v1294_v45 = vld [vmem:[#allocation6 + $0x1c4] ss:$8 sps:$4 sm:$0xff]   ;;  %v1296_v46 = vld [vmem:[#allocation6 + $0xc0] ss:$8 sps:$4 sm:$0xff]  }
  0x45   :  { %554 = vmatprep.subr.bf16.mxu1 %v1252_v17  ;;  %v1297_v47 = vld [vmem:[#allocation6 + $0x1c0] ss:$8 sps:$4 sm:$0xff]   ;;  %v1298_v48 = vld [vmem:[#allocation6 + $0xb4] ss:$8 sps:$4 sm:$0xff]   ;;  %v1302_v52 = vld [vmem:[#allocation6 + $0xb0] ss:$8 sps:$4 sm:$0xff]  }
  0x46   :  { %v1324_v49 = vld [vmem:[#allocation3 + $0x4] ss:$16 sps:$4 sm:$0xff]   ;;  %v1327_v51 = vld [vmem:[#allocation3 + $0xc] ss:$16 sps:$4 sm:$0xff]   ;;  %v1303_v53 = vld [vmem:[#allocation6 + $0x1b0] ss:$8 sps:$4 sm:$0xff]  }
  0x47   :  { %512 = vmatpush1.bf16.msra.mxu0 %v1254_v18  ;;  %v1300_v50 = vld [vmem:[#allocation6 + $0x1b4] ss:$8 sps:$4 sm:$0xff]   ;;  %535 = vmatprep.mubr.bf16.mxu0 %v1324_v49  ;;  %v1304_v54 = vld [vmem:[#allocation6 + $0xa4] ss:$8 sps:$4 sm:$0xff]   ;;  %v1308_v56 = vld [vmem:[#allocation6 + $0xa0] ss:$8 sps:$4 sm:$0xff]  }
  0x48   :  { %555 = vmatpush1.bf16.msra.mxu1 %v1255_v19  ;;  %513 = vmatprep.subr.bf16.mxu0 %v1256_v20  ;;  %v1306_v55 = vld [vmem:[#allocation6 + $0x1a4] ss:$8 sps:$4 sm:$0xff]   ;;  %v1309_v57 = vld [vmem:[#allocation6 + $0x1a0] ss:$8 sps:$4 sm:$0xff]   ;;  %v1310_v58 = vld [vmem:[#allocation6 + $0x94] ss:$8 sps:$4 sm:$0xff]  }
  0x49   :  { %556 = vmatprep.subr.bf16.mxu1 %v1258_v21  ;;  %578 = vmatprep.mubr.bf16.mxu1 %v1327_v51  ;;  %v1312_v59 = vld [vmem:[#allocation6 + $0x194] ss:$8 sps:$4 sm:$0xff]   ;;  %v1314_v60 = vld [vmem:[#allocation6 + $0x90] ss:$8 sps:$4 sm:$0xff]   ;;  %v1316_v62 = vld [vmem:[#allocation6 + $0x84] ss:$8 sps:$4 sm:$0xff]  }
  0x4a   :  { %v1315_v61 = vld [vmem:[#allocation6 + $0x190] ss:$8 sps:$4 sm:$0xff]   ;;  %v1318_v63 = vld [vmem:[#allocation6 + $0x184] ss:$8 sps:$4 sm:$0xff]   ;;  %v1320_v0 = vld [vmem:[#allocation6 + $0x80] ss:$8 sps:$4 sm:$0xff]  }
  0x4b   :  { %514 = vmatpush1.bf16.msra.mxu0 %v1260_v22  ;;  %v1321_v1 = vld [vmem:[#allocation6 + $0x180] ss:$8 sps:$4 sm:$0xff]   ;;  %v1330_v4 = vld [vmem:[#allocation8 + $0x74] ss:$8 sps:$4 sm:$0xff]   ;;  %v1328_v5 = vld [vmem:[#allocation8 + $0x70] ss:$8 sps:$4 sm:$0xff]  }
  0x4c   :  { %557 = vmatpush1.bf16.msra.mxu1 %v1261_v23  ;;  %515 = vmatprep.subr.bf16.mxu0 %v1262_v24  ;;  %v1322_v2 = vld [vmem:[#allocation3] ss:$16 sps:$4 sm:$0xff]   ;;  %v1325_v3 = vld [vmem:[#allocation3 + $0x8] ss:$16 sps:$4 sm:$0xff]   ;;  %v1333_v6 = vld [vmem:[#allocation8 + $0x64] ss:$8 sps:$4 sm:$0xff]  }
  0x4d   :  { %558 = vmatprep.subr.bf16.mxu1 %v1264_v25  ;;  %v1331_v7 = vld [vmem:[#allocation8 + $0x60] ss:$8 sps:$4 sm:$0xff]   ;;  %v1336_v8 = vld [vmem:[#allocation8 + $0x54] ss:$8 sps:$4 sm:$0xff]   ;;  %v1334_v9 = vld [vmem:[#allocation8 + $0x50] ss:$8 sps:$4 sm:$0xff]  }
  0x4e   :  { %v1339_v10 = vld [vmem:[#allocation8 + $0x44] ss:$8 sps:$4 sm:$0xff]   ;;  %v1337_v11 = vld [vmem:[#allocation8 + $0x40] ss:$8 sps:$4 sm:$0xff]   ;;  %v1342_v12 = vld [vmem:[#allocation8 + $0x34] ss:$8 sps:$4 sm:$0xff]  }
  0x4f   :  { %516 = vmatpush1.bf16.msra.mxu0 %v1266_v26  ;;  %v1340_v13 = vld [vmem:[#allocation8 + $0x30] ss:$8 sps:$4 sm:$0xff]   ;;  %v1345_v14 = vld [vmem:[#allocation8 + $0x24] ss:$8 sps:$4 sm:$0xff]   ;;  %v1343_v15 = vld [vmem:[#allocation8 + $0x20] ss:$8 sps:$4 sm:$0xff]  }
  0x50   :  { %559 = vmatpush1.bf16.msra.mxu1 %v1267_v27  ;;  %517 = vmatprep.subr.bf16.mxu0 %v1268_v28  ;;  %v1348_v16 = vld [vmem:[#allocation8 + $0x14] ss:$8 sps:$4 sm:$0xff]   ;;  %v1346_v17 = vld [vmem:[#allocation8 + $0x10] ss:$8 sps:$4 sm:$0xff]   ;;  %v1351_v18 = vld [vmem:[#allocation8 + $0x4] ss:$8 sps:$4 sm:$0xff]  }
  0x51   :  { %560 = vmatprep.subr.bf16.mxu1 %v1270_v29  ;;  %v1349_v19 = vld [vmem:[#allocation8] ss:$8 sps:$4 sm:$0xff]   ;;  %v1354_v20 = vld [vmem:[#allocation8 + $0xf4] ss:$8 sps:$4 sm:$0xff]   ;;  %v1352_v21 = vld [vmem:[#allocation8 + $0xf0] ss:$8 sps:$4 sm:$0xff]  }
  0x52   :  { %v1357_v22 = vld [vmem:[#allocation8 + $0xe4] ss:$8 sps:$4 sm:$0xff]   ;;  %v1355_v23 = vld [vmem:[#allocation8 + $0xe0] ss:$8 sps:$4 sm:$0xff]   ;;  %v1360_v24 = vld [vmem:[#allocation8 + $0xd4] ss:$8 sps:$4 sm:$0xff]  }
  0x53   :  { %518 = vmatpush1.bf16.msra.mxu0 %v1272_v30  ;;  %v1358_v25 = vld [vmem:[#allocation8 + $0xd0] ss:$8 sps:$4 sm:$0xff]   ;;  %v1363_v26 = vld [vmem:[#allocation8 + $0xc4] ss:$8 sps:$4 sm:$0xff]   ;;  %v1361_v27 = vld [vmem:[#allocation8 + $0xc0] ss:$8 sps:$4 sm:$0xff]  }
  0x54   :  { %561 = vmatpush1.bf16.msra.mxu1 %v1273_v31  ;;  %519 = vmatprep.subr.bf16.mxu0 %v1274_v32  ;;  %v1366_v28 = vld [vmem:[#allocation8 + $0xb4] ss:$8 sps:$4 sm:$0xff]   ;;  %v1364_v29 = vld [vmem:[#allocation8 + $0xb0] ss:$8 sps:$4 sm:$0xff]   ;;  %v1369_v30 = vld [vmem:[#allocation8 + $0xa4] ss:$8 sps:$4 sm:$0xff]  }
  0x55   :  { %562 = vmatprep.subr.bf16.mxu1 %v1276_v33  ;;  %v1367_v31 = vld [vmem:[#allocation8 + $0xa0] ss:$8 sps:$4 sm:$0xff]   ;;  %v1372_v32 = vld [vmem:[#allocation8 + $0x94] ss:$8 sps:$4 sm:$0xff]   ;;  %v1370_v33 = vld [vmem:[#allocation8 + $0x90] ss:$8 sps:$4 sm:$0xff]  }
  0x56   :  { %s1510_s29 = smov [#allocation11]  }
  0x57   :  { %520 = vmatpush2.bf16.msra.mxu0 %v1278_v34  ;;  %v1375_v34 = vld [vmem:[#allocation8 + $0x84] ss:$8 sps:$4 sm:$0xff]   ;;  %s1062_s30 = sshll.u32 %s1510_s29, 4  ;;  %s1063_s30 = int_to_ptr.vmem [resolvable:$true] %s1062_s30 }
  0x58   :  { %563 = vmatpush2.bf16.msra.mxu1 %v1279_v35  ;;  %521 = vmatprep.subr.bf16.mxu0 %v1280_v36  ;;  %v1373_v35 = vld [vmem:[#allocation8 + $0x80] ss:$8 sps:$4 sm:$0xff]   ;;  %v1376_v36 = vld [vmem:[#allocation9 + $0x78] sm:$0xff]   ;;  %s1472_s8 = scalar_lea.vmem %s1063_s30, 256  ;;  %p1477_p7 = scmp.lt.s32.totalorder %s1063_s30, %s1063_s30 }
  0x59   :  { %564 = vmatprep.subr.bf16.mxu1 %v1282_v37  ;;  %v1377_v37 = vld [vmem:[#allocation9 + $0x38] sm:$0xff]   ;;  %p1473_p6 = scmp.ne.s32.totalorder %s1063_s30, %s1472_s8  ;;  %p1478_p8 = scmp.lt.s32.totalorder %s1472_s8, %s1472_s8 }
  0x5b   :  { %522 = vmatpush2.bf16.msra.mxu0 %v1284_v38  ;;  %v1378_v38 = vld [vmem:[#allocation9 + $0x70] sm:$0xff]   ;;  %p1479_p9 = por %p1478_p8, %p1477_p7 }
  0x5c   :  { %565 = vmatpush2.bf16.msra.mxu1 %v1285_v39  ;;  %523 = vmatprep.subr.bf16.mxu0 %v1286_v40  ;;  %v1379_v39 = vld [vmem:[#allocation9 + $0x30] sm:$0xff]   ;;  %v1380_v40 = vld [vmem:[#allocation9 + $0x68] sm:$0xff]  }
  0x5d   :  { %566 = vmatprep.subr.bf16.mxu1 %v1288_v41  ;;  %v1381_v41 = vld [vmem:[#allocation9 + $0x28] sm:$0xff]   ;;  %p1480_p10 = pnand %p1479_p9, %p1473_p6 }
  0x5f   :  { %524 = vmatpush2.bf16.msra.mxu0 %v1290_v42  ;;  %v1382_v42 = vld [vmem:[#allocation9 + $0x60] sm:$0xff]  }
  0x60   :  { %567 = vmatpush2.bf16.msra.mxu1 %v1291_v43  ;;  %525 = vmatprep.subr.bf16.mxu0 %v1292_v44  ;;  %v1383_v43 = vld [vmem:[#allocation9 + $0x20] sm:$0xff]   ;;  %v1384_v44 = vld [vmem:[#allocation9 + $0x58] sm:$0xff]  }
  0x61   :  { %568 = vmatprep.subr.bf16.mxu1 %v1294_v45  ;;  %v1385_v45 = vld [vmem:[#allocation9 + $0x18] sm:$0xff]  }
  0x63   :  { %526 = vmatpush2.bf16.msra.mxu0 %v1296_v46  ;;  %v606_v46 = vlaneseq }
  0x64   :  { %569 = vmatpush2.bf16.msra.mxu1 %v1297_v47  ;;  %527 = vmatprep.subr.bf16.mxu0 %v1298_v48 }
  0x65   :  { %570 = vmatprep.subr.bf16.mxu1 %v1300_v50  ;;  %v607_v47 = vshrl.u32 %v606_v46, 7 }
  0x67   :  { %528 = vmatpush2.bf16.msra.mxu0 %v1302_v52  ;;  %v612_v48 = vsub.s32 1, %v607_v47  ;;  %v608_v51 = vsub.s32 0, %v607_v47  ;;  %v604_v52 = vld [vmem:[%s1586_s2] sm:$0x3] }
  0x68   :  { %571 = vmatpush2.bf16.msra.mxu1 %v1303_v53  ;;  %529 = vmatprep.subr.bf16.mxu0 %v1304_v54 }
  0x69   :  { %572 = vmatprep.subr.bf16.mxu1 %v1306_v55 }
  0x6b   :  { %530 = vmatpush2.bf16.msra.mxu0 %v1308_v56  ;;  %v613_v56 = vrot.slane %v604_v52, %v612_v48 }
  0x6c   :  { %573 = vmatpush2.bf16.msra.mxu1 %v1309_v57  ;;  %531 = vmatprep.subr.bf16.mxu0 %v1310_v58  ;;  %v609_v58 = vrot.slane %v604_v52, %v608_v51 }
  0x6d   :  { %574 = vmatprep.subr.bf16.mxu1 %v1312_v59 }
  0x6f   :  { %532 = vmatpush2.bf16.msra.mxu0 %v1314_v60 }
  0x70   :  { %575 = vmatpush2.bf16.msra.mxu1 %v1315_v61  ;;  %533 = vmatprep.subr.bf16.mxu0 %v1316_v62 }
  0x71   :  { %576 = vmatprep.subr.bf16.mxu1 %v1318_v63 }
  0x73   :  { %534 = vmatpush2.bf16.msra.mxu0 %v1320_v0 }
  0x74   :  { %577 = vmatpush2.bf16.msra.mxu1 %v1321_v1  ;;  %830 = vmatprep.subr.bf16.mxu0 %v1330_v4 }
  0x75   :  { %1193 = vmatprep.subr.bf16.mxu1 %v1376_v36 }
  0x76   :  { %536 = vmatmul.mubr.bf16.vlgmr.msra.gmra.mxu0 %v1322_v2 }
  0x77   :  { %579 = vmatmul.mubr.bf16.vlgmr.msra.gmra.mxu1 %v1325_v3  ;;  %831 = vmatpush1.bf16.msra.mxu0 %v1328_v5 }
  0x78   :  { %832 = vmatprep.subr.bf16.mxu0 %v1333_v6  ;;  %1194 = vmatpush3.bf16.msra.mxu1 %v1377_v37 }
  0x79   :  { %1195 = vmatprep.subr.bf16.mxu1 %v1378_v38 }
  0x7b   :  { %833 = vmatpush1.bf16.msra.mxu0 %v1331_v7 }
  0x7c   :  { %834 = vmatprep.subr.bf16.mxu0 %v1336_v8  ;;  %1196 = vmatpush3.bf16.msra.mxu1 %v1379_v39 }
  0x7d   :  { %1197 = vmatprep.subr.bf16.mxu1 %v1380_v40 }
  0x7f   :  { %835 = vmatpush1.bf16.msra.mxu0 %v1334_v9 }
  0x80   :  { %836 = vmatprep.subr.bf16.mxu0 %v1339_v10  ;;  %1198 = vmatpush3.bf16.msra.mxu1 %v1381_v41 }
  0x81   :  { %1199 = vmatprep.subr.bf16.mxu1 %v1382_v42 }
  0x83   :  { %837 = vmatpush1.bf16.msra.mxu0 %v1337_v11  ;;  %v1386_v11 = vld [vmem:[#allocation9 + $0x50] sm:$0xff]  }
  0x84   :  { %838 = vmatprep.subr.bf16.mxu0 %v1342_v12  ;;  %1200 = vmatpush3.bf16.msra.mxu1 %v1383_v43  ;;  %v1387_v12 = vld [vmem:[#allocation9 + $0x10] sm:$0xff]  }
  0x85   :  { %1201 = vmatprep.subr.bf16.mxu1 %v1384_v44 }
  0x87   :  { %839 = vmatpush1.bf16.msra.mxu0 %v1340_v13  ;;  %v1388_v13 = vld [vmem:[#allocation9 + $0x48] sm:$0xff]  }
  0x88   :  { %840 = vmatprep.subr.bf16.mxu0 %v1345_v14  ;;  %1202 = vmatpush3.bf16.msra.mxu1 %v1385_v45  ;;  %v1389_v14 = vld [vmem:[#allocation9 + $0x8] sm:$0xff]  }
  0x89   :  { %1203 = vmatprep.subr.bf16.mxu1 %v1386_v11 }
  0x8b   :  { %841 = vmatpush1.bf16.msra.mxu0 %v1343_v15  ;;  %v1390_v15 = vld [vmem:[#allocation9 + $0x40] sm:$0xff]  }
  0x8c   :  { %842 = vmatprep.subr.bf16.mxu0 %v1348_v16  ;;  %1204 = vmatpush3.bf16.msra.mxu1 %v1387_v12  ;;  %v1391_v16 = vld [vmem:[#allocation9] sm:$0xff]  }
  0x8d   :  { %1205 = vmatprep.subr.bf16.mxu1 %v1388_v13 }
  0x8f   :  { %843 = vmatpush1.bf16.msra.mxu0 %v1346_v17  ;;  %v658_v17 = vld [vmem:[%s1588_s4] sm:$0x3] }
  0x90   :  { %844 = vmatprep.subr.bf16.mxu0 %v1351_v18  ;;  %1206 = vmatpush3.bf16.msra.mxu1 %v1389_v14 }
  0x91   :  { %1207 = vmatprep.subr.bf16.mxu1 %v1390_v15 }
  0x93   :  { %845 = vmatpush1.bf16.msra.mxu0 %v1349_v19  ;;  %v667_v19 = vrot.slane %v658_v17, %v612_v48 }
  0x94   :  { %846 = vmatprep.subr.bf16.mxu0 %v1354_v20  ;;  %1208 = vmatpush3.bf16.msra.mxu1 %v1391_v16  ;;  %v663_v20 = vrot.slane %v658_v17, %v608_v51 }
  0x97   :  { %847 = vmatpush2.bf16.msra.mxu0 %v1352_v21 }
  0x98   :  { %848 = vmatprep.subr.bf16.mxu0 %v1357_v22 }
  0x9b   :  { %849 = vmatpush2.bf16.msra.mxu0 %v1355_v23 }
  0x9c   :  { %850 = vmatprep.subr.bf16.mxu0 %v1360_v24 }
  0x9f   :  { %851 = vmatpush2.bf16.msra.mxu0 %v1358_v25 }
  0xa0   :  { %852 = vmatprep.subr.bf16.mxu0 %v1363_v26 }
  0xa3   :  { %853 = vmatpush2.bf16.msra.mxu0 %v1361_v27 }
  0xa4   :  { %854 = vmatprep.subr.bf16.mxu0 %v1366_v28 }
  0xa7   :  { %855 = vmatpush2.bf16.msra.mxu0 %v1364_v29 }
  0xa8   :  { %856 = vmatprep.subr.bf16.mxu0 %v1369_v30 }
  0xab   :  { %857 = vmatpush2.bf16.msra.mxu0 %v1367_v31 }
  0xac   :  { %858 = vmatprep.subr.bf16.mxu0 %v1372_v32 }
  0xaf   :  { %859 = vmatpush2.bf16.msra.mxu0 %v1370_v33 }
  0xb0   :  { %860 = vmatprep.subr.bf16.mxu0 %v1375_v34 }
  0xb3   :  { %861 = vmatpush2.bf16.msra.mxu0 %v1373_v35  ;;  %v1176_v35 = vld [vmem:[%s1590_s6] ss:$0 sm:$0xff] }
 0x136   :  { %v537_v49 = vpop.f32.mrf.mxu0 }
 0x137   :  { %v580_v50 = vpop.f32.mrf.mxu1 }
 0x138   :  { %v539_v53 = vpop.f32.mrf.mxu0  ;;  %v581_v57 = vadd.f32 %v580_v50, %v537_v49 }
 0x139   :  { %v582_v54 = vpop.f32.mrf.mxu1 }
 0x13a   :  { %v583_v55 = vadd.f32 %v582_v54, %v539_v53  ;;  %v541_v59 = vpop.f32.mrf.mxu0  ;;  %v616_v3 = vadd.f32 %v609_v58, %v581_v57 }
 0x13b   :  { %v584_v60 = vpop.f32.mrf.mxu1 }
 0x13c   :  { %v585_v61 = vadd.f32 %v584_v60, %v541_v59  ;;  %v543_v62 = vpop.f32.mrf.mxu0  ;;  %v617_v0 = vadd.f32 %v613_v56, %v583_v55  ;;  %v620_v8 = vmax.f32 %v616_v3, 0.0 }
 0x13d   :  { %v586_v63 = vpop.f32.mrf.mxu1 }
 0x13e   :  { %v618_v1 = vadd.f32 %v609_v58, %v585_v61  ;;  %v587_v2 = vadd.f32 %v586_v63, %v543_v62  ;;  %v621_v6 = vmax.f32 %v617_v0, 0.0 }
 0x140   :  { %v619_v4 = vadd.f32 %v613_v56, %v587_v2  ;;  %v622_v5 = vmax.f32 %v618_v1, 0.0 }
 0x142   :  { %v623_v7 = vmax.f32 %v619_v4, 0.0  ;;  %v624_v10 = vpack.c.bf16 %v622_v5, %v620_v8 }
 0x144   :  { %v625_v9 = vpack.c.bf16 %v623_v7, %v621_v6 }
 0x146   :  { %862 = vmatprep.mubr.bf16.mxu0 %v625_v9 }
 0x147   :  { %863 = vmatmul.mubr.bf16.vlgmr.msra.gmra.mxu0 %v624_v10 }
 0x207   :  { %v864_v18 = vpop.f32.mrf.mxu0 }
 0x208   :  { %v865_v25 = vadd.f32 %v864_v18, %v663_v20 }
 0x209   :  { %v866_v21 = vpop.f32.mrf.mxu0 }
 0x20a   :  { %v867_v23 = vadd.f32 %v866_v21, %v667_v19  ;;  %v873_v31 = vmax.f32 %v865_v25, 0.0 }
 0x20b   :  { %v868_v22 = vpop.f32.mrf.mxu0 }
 0x20c   :  { %v869_v24 = vadd.f32 %v868_v22, %v663_v20  ;;  %v874_v29 = vmax.f32 %v867_v23, 0.0 }
 0x20d   :  { %v870_v26 = vpop.f32.mrf.mxu0 }
 0x20e   :  { %v871_v27 = vadd.f32 %v870_v26, %v667_v19  ;;  %v875_v28 = vmax.f32 %v869_v24, 0.0 }
 0x210   :  { %v876_v30 = vmax.f32 %v871_v27, 0.0  ;;  %v877_v33 = vpack.c.bf16 %v875_v28, %v873_v31 }
 0x212   :  { %v878_v32 = vpack.c.bf16 %v876_v30, %v874_v29 }
 0x214   :  { %1046 = vmatprep.mubr.bf16.mxu1 %v878_v32 }
 0x215   :  { %1047 = vmatmul.mubr.bf16.vlgmr.msra.gmra.mxu1 %v877_v33 }
 0x2d5   :  { %v1209_v34 = vpop.f32.mrf.mxu1 }
 0x2d7   :  { %v1210_v36 = vpop.f32.mrf.mxu1 }
 0x2d8   :  { %v1211_v37 = vadd.f32 %v1210_v36, %v1209_v34 }
 0x2d9   :  { %v1212_v38 = vpop.f32.mrf.mxu1 }
 0x2da   :  { %v1049_v39 = vadd.f32 %v1211_v37, %v1176_v35 }
 0x2db   :  { %v1213_v40 = vpop.f32.mrf.mxu1 }
 0x2dc   :  { %1055 = vst [vmem:[#allocation11] sm:$0xff] %v1049_v39  ;;  %v1214_v41 = vadd.f32 %v1213_v40, %v1212_v38 }
 0x2de   :  { %v1052_v42 = vadd.f32 %v1214_v41, %v1176_v35 }
 0x2e0   :  { %1056 = vst [vmem:[#allocation11 + $0x8] sm:$0xff] %v1052_v42 }
 0x2e1   :  { %1483 = shalt.err (!%p1480_p10)
}
 0x2e2   :  { %1068 = dma.vmem_to_hbm [thread:$0]  %s1063_s30, 256, %s1591_s7, [#allocation5], %s1501_s27, %s1501_s27, %s1502_s28  }
 0x2e3   :  { %1498 = dma.done.wait [#allocation5], 256  }
 0x2e4   :  { %1499 = vsyncadd [#allocation5], 4294967040 }
 0x2e5   :  { %1072 = vsyncpa [#allocation4], 1 }
 0x2e6   :  { %1073 = vsyncpa [#allocation7], 1 }
 0x2e7   :  { %1074 = vsyncpa [#allocation10], 1 }
 0x2e8   :  { %1075 = vsyncpa [#allocation5], 1 }

// kernel: tpu_custom_call.1
= control target key start
LH: loop header
LB: loop body
LE: loop exit
PB: predicated region body
PF: predicated region fallthrough
CT: control target
= control target key end

     0   :  { %12 = vsyncpa [#allocation4], 0  ;;  %s1584_s0 = inlined_call_operand.hbm [shape: bf16[16,512], index: 0, kind: input, shape index: {}]   ;;  %s1585_s1 = inlined_call_operand.hbm [shape: bf16[512,256], index: 1, kind: input, shape index: {}]   ;;  %s1586_s2 = inlined_call_operand.vmem [shape: f32[1,256], index: 2, kind: input, shape index: {}]   ;;  %s1587_s3 = inlined_call_operand.hbm [shape: bf16[256,256], index: 3, kind: input, shape index: {}]   ;;  %s1588_s4 = inlined_call_operand.vmem [shape: f32[1,256], index: 4, kind: input, shape index: {}]   ;;  %s1589_s5 = inlined_call_operand.hbm [shape: bf16[256,128], index: 5, kind: input, shape index: {}]   ;;  %s1590_s6 = inlined_call_operand.vmem [shape: f32[1,128], index: 6, kind: input, shape index: {}]   ;;  %s1591_s7 = inlined_call_operand.hbm [shape: f32[16,128], index: 7, kind: output, shape index: {}]  }
   0x1   :  { %13 = vsyncpa [#allocation7], 0 }
   0x2   :  { %14 = vsyncpa [#allocation10], 0 }
   0x3   :  { %15 = vsyncpa [#allocation5], 0  ;;  %s1500_s24 = smov [#allocation6]  }
   0x4   :  { %s33_s25 = sshll.u32 %s1500_s24, 4  ;;  %s34_s25 = int_to_ptr.vmem [resolvable:$true] %s33_s25 }
   0x5   :  { %s1400_s26 = scalar_lea.vmem %s34_s25, 8192  ;;  %p1405_p1 = scmp.lt.s32.totalorder %s34_s25, %s34_s25 }
   0x6   :  { %p1401_p0 = scmp.ne.s32.totalorder %s34_s25, %s1400_s26  ;;  %p1406_p2 = scmp.lt.s32.totalorder %s1400_s26, %s1400_s26 }
   0x8   :  { %p1407_p3 = por %p1406_p2, %p1405_p1 }
   0xa   :  { %p1408_p4 = pnand %p1407_p3, %p1401_p0 }
   0xc   :  { %1411 = shalt.err (!%p1408_p4)
}
   0xd   :  { %s1501_s27 = smov 128   ;;  %s1502_s28 = smov 8  }
   0xe   :  { %39 = dma.hbm_to_vmem [thread:$0]  %s1585_s1, 8192, %s34_s25, [#allocation7], %s1501_s27, %s1501_s27, %s1502_s28  }
   0xf   :  { %s1503_s8 = smov [#allocation3]  }
  0x10   :  { %s21_s9 = sshll.u32 %s1503_s8, 4  ;;  %s22_s9 = int_to_ptr.vmem [resolvable:$true] %s21_s9 }
  0x11   :  { %s1420_s10 = scalar_lea.vmem %s22_s9, 512  ;;  %p1425_p6 = scmp.lt.s32.totalorder %s22_s9, %s22_s9 }
  0x12   :  { %p1421_p5 = scmp.ne.s32.totalorder %s22_s9, %s1420_s10  ;;  %p1426_p7 = scmp.lt.s32.totalorder %s1420_s10, %s1420_s10 }
  0x14   :  { %p1427_p8 = por %p1426_p7, %p1425_p6 }
  0x16   :  { %p1428_p9 = pnand %p1427_p8, %p1421_p5 }
  0x18   :  { %1431 = shalt.err (!%p1428_p9)
}
  0x19   :  { %s1504_s11 = smov 256   ;;  %s1505_s12 = smov 16  }
  0x1a   :  { %27 = dma.hbm_to_vmem [thread:$0]  %s1584_s0, 512, %s22_s9, [#allocation4], %s1504_s11, %s1504_s11, %s1505_s12  }
  0x1b   :  { %s1506_s15 = smov [#allocation8]   ;;  %s1507_s17 = smov [#allocation9]  }
  0x1c   :  { %s47_s16 = sshll.u32 %s1506_s15, 4  ;;  %s61_s1 = sshll.u32 %s1507_s17, 4  ;;  %s48_s16 = int_to_ptr.vmem [resolvable:$true] %s47_s16  ;;  %s62_s1 = int_to_ptr.vmem [resolvable:$true] %s61_s1 }
  0x1d   :  { %s1440_s18 = scalar_lea.vmem %s48_s16, 4096  ;;  %p1445_p11 = scmp.lt.s32.totalorder %s48_s16, %s48_s16 }
  0x1e   :  { %p1441_p10 = scmp.ne.s32.totalorder %s48_s16, %s1440_s18  ;;  %p1446_p12 = scmp.lt.s32.totalorder %s1440_s18, %s1440_s18 }
  0x20   :  { %p1447_p13 = por %p1446_p12, %p1445_p11 }
  0x22   :  { %p1448_p0 = pnand %p1447_p13, %p1441_p10 }
  0x24   :  { %1451 = shalt.err (!%p1448_p0)
}
  0x25   :  { %53 = dma.hbm_to_vmem [thread:$0]  %s1587_s3, 4096, %s48_s16, [#allocation7], %s1501_s27, %s1501_s27, %s1502_s28  }
  0x26   :  { %s1460_s0 = scalar_lea.vmem %s62_s1, 2048  ;;  %p1465_p2 = scmp.lt.s32.totalorder %s62_s1, %s62_s1 }
  0x27   :  { %p1461_p1 = scmp.ne.s32.totalorder %s62_s1, %s1460_s0  ;;  %p1466_p3 = scmp.lt.s32.totalorder %s1460_s0, %s1460_s0 }
  0x29   :  { %p1467_p4 = por %p1466_p3, %p1465_p2 }
  0x2b   :  { %p1468_p5 = pnand %p1467_p4, %p1461_p1 }
  0x2d   :  { %1471 = shalt.err (!%p1468_p5)
}
  0x2e   :  { %s1508_s21 = smov 64   ;;  %s1509_s22 = smov 4  }
  0x2f   :  { %67 = dma.hbm_to_vmem [thread:$0]  %s1589_s5, 2048, %s62_s1, [#allocation10], %s1508_s21, %s1508_s21, %s1509_s22  }
  0x30   :  { %1492 = dma.done.wait [#allocation4], 512  }
  0x31   :  { %1493 = vsyncadd [#allocation4], 4294966784 }
  0x32   :  { %1494 = dma.done.wait [#allocation7], 12288  }
  0x33   :  { %1495 = vsyncadd [#allocation7], 4294955008 }
  0x34   :  { %1496 = dma.done.wait [#allocation10], 2048  }
  0x35   :  { %1497 = vsyncadd [#allocation10], 4294965248  ;;  %v1226_v0 = vld [vmem:[#allocation6 + $0x74] ss:$8 sps:$4 sm:$0xff]   ;;  %v1230_v2 = vld [vmem:[#allocation6 + $0x70] ss:$8 sps:$4 sm:$0xff]  }
  0x36   :  { %v1228_v1 = vld [vmem:[#allocation6 + $0x174] ss:$8 sps:$4 sm:$0xff]   ;;  %503 = vmatprep.subr.bf16.mxu0 %v1226_v0  ;;  %v1231_v3 = vld [vmem:[#allocation6 + $0x170] ss:$8 sps:$4 sm:$0xff]   ;;  %v1232_v4 = vld [vmem:[#allocation6 + $0x64] ss:$8 sps:$4 sm:$0xff]  }
  0x37   :  { %546 = vmatprep.subr.bf16.mxu1 %v1228_v1  ;;  %504 = vmatpush1.bf16.msra.mxu0 %v1230_v2  ;;  %v1234_v5 = vld [vmem:[#allocation6 + $0x164] ss:$8 sps:$4 sm:$0xff]   ;;  %v1236_v6 = vld [vmem:[#allocation6 + $0x60] ss:$8 sps:$4 sm:$0xff]   ;;  %v1238_v8 = vld [vmem:[#allocation6 + $0x54] ss:$8 sps:$4 sm:$0xff]  }
  0x38   :  { %547 = vmatpush1.bf16.msra.mxu1 %v1231_v3  ;;  %505 = vmatprep.subr.bf16.mxu0 %v1232_v4  ;;  %v1237_v7 = vld [vmem:[#allocation6 + $0x160] ss:$8 sps:$4 sm:$0xff]   ;;  %v1240_v9 = vld [vmem:[#allocation6 + $0x154] ss:$8 sps:$4 sm:$0xff]   ;;  %v1242_v10 = vld [vmem:[#allocation6 + $0x50] ss:$8 sps:$4 sm:$0xff]  }
  0x39   :  { %548 = vmatprep.subr.bf16.mxu1 %v1234_v5  ;;  %v1243_v11 = vld [vmem:[#allocation6 + $0x150] ss:$8 sps:$4 sm:$0xff]   ;;  %v1244_v12 = vld [vmem:[#allocation6 + $0x44] ss:$8 sps:$4 sm:$0xff]   ;;  %v1248_v14 = vld [vmem:[#allocation6 + $0x40] ss:$8 sps:$4 sm:$0xff]  }
  0x3a   :  { %v1246_v13 = vld [vmem:[#allocation6 + $0x144] ss:$8 sps:$4 sm:$0xff]   ;;  %v1249_v15 = vld [vmem:[#allocation6 + $0x140] ss:$8 sps:$4 sm:$0xff]   ;;  %v1250_v16 = vld [vmem:[#allocation6 + $0x34] ss:$8 sps:$4 sm:$0xff]  }
  0x3b   :  { %506 = vmatpush1.bf16.msra.mxu0 %v1236_v6  ;;  %v1252_v17 = vld [vmem:[#allocation6 + $0x134] ss:$8 sps:$4 sm:$0xff]   ;;  %v1254_v18 = vld [vmem:[#allocation6 + $0x30] ss:$8 sps:$4 sm:$0xff]   ;;  %v1256_v20 = vld [vmem:[#allocation6 + $0x24] ss:$8 sps:$4 sm:$0xff]  }
  0x3c   :  { %549 = vmatpush1.bf16.msra.mxu1 %v1237_v7  ;;  %507 = vmatprep.subr.bf16.mxu0 %v1238_v8  ;;  %v1255_v19 = vld [vmem:[#allocation6 + $0x130] ss:$8 sps:$4 sm:$0xff]   ;;  %v1258_v21 = vld [vmem:[#allocation6 + $0x124] ss:$8 sps:$4 sm:$0xff]   ;;  %v1260_v22 = vld [vmem:[#allocation6 + $0x20] ss:$8 sps:$4 sm:$0xff]  }
  0x3d   :  { %550 = vmatprep.subr.bf16.mxu1 %v1240_v9  ;;  %v1261_v23 = vld [vmem:[#allocation6 + $0x120] ss:$8 sps:$4 sm:$0xff]   ;;  %v1262_v24 = vld [vmem:[#allocation6 + $0x14] ss:$8 sps:$4 sm:$0xff]   ;;  %v1266_v26 = vld [vmem:[#allocation6 + $0x10] ss:$8 sps:$4 sm:$0xff]  }
  0x3e   :  { %v1264_v25 = vld [vmem:[#allocation6 + $0x114] ss:$8 sps:$4 sm:$0xff]   ;;  %v1267_v27 = vld [vmem:[#allocation6 + $0x110] ss:$8 sps:$4 sm:$0xff]   ;;  %v1268_v28 = vld [vmem:[#allocation6 + $0x4] ss:$8 sps:$4 sm:$0xff]  }
  0x3f   :  { %508 = vmatpush1.bf16.msra.mxu0 %v1242_v10  ;;  %v1270_v29 = vld [vmem:[#allocation6 + $0x104] ss:$8 sps:$4 sm:$0xff]   ;;  %v1272_v30 = vld [vmem:[#allocation6] ss:$8 sps:$4 sm:$0xff]   ;;  %v1274_v32 = vld [vmem:[#allocation6 + $0xf4] ss:$8 sps:$4 sm:$0xff]  }
  0x40   :  { %551 = vmatpush1.bf16.msra.mxu1 %v1243_v11  ;;  %509 = vmatprep.subr.bf16.mxu0 %v1244_v12  ;;  %v1273_v31 = vld [vmem:[#allocation6 + $0x100] ss:$8 sps:$4 sm:$0xff]   ;;  %v1276_v33 = vld [vmem:[#allocation6 + $0x1f4] ss:$8 sps:$4 sm:$0xff]   ;;  %v1278_v34 = vld [vmem:[#allocation6 + $0xf0] ss:$8 sps:$4 sm:$0xff]  }
  0x41   :  { %552 = vmatprep.subr.bf16.mxu1 %v1246_v13  ;;  %v1279_v35 = vld [vmem:[#allocation6 + $0x1f0] ss:$8 sps:$4 sm:$0xff]   ;;  %v1280_v36 = vld [vmem:[#allocation6 + $0xe4] ss:$8 sps:$4 sm:$0xff]   ;;  %v1284_v38 = vld [vmem:[#allocation6 + $0xe0] ss:$8 sps:$4 sm:$0xff]  }
  0x42   :  { %v1282_v37 = vld [vmem:[#allocation6 + $0x1e4] ss:$8 sps:$4 sm:$0xff]   ;;  %v1285_v39 = vld [vmem:[#allocation6 + $0x1e0] ss:$8 sps:$4 sm:$0xff]   ;;  %v1286_v40 = vld [vmem:[#allocation6 + $0xd4] ss:$8 sps:$4 sm:$0xff]  }
  0x43   :  { %510 = vmatpush1.bf16.msra.mxu0 %v1248_v14  ;;  %v1288_v41 = vld [vmem:[#allocation6 + $0x1d4] ss:$8 sps:$4 sm:$0xff]   ;;  %v1290_v42 = vld [vmem:[#allocation6 + $0xd0] ss:$8 sps:$4 sm:$0xff]   ;;  %v1292_v44 = vld [vmem:[#allocation6 + $0xc4] ss:$8 sps:$4 sm:$0xff]  }
  0x44   :  { %553 = vmatpush1.bf16.msra.mxu1 %v1249_v15  ;;  %511 = vmatprep.subr.bf16.mxu0 %v1250_v16  ;;  %v1291_v43 = vld [vmem:[#allocation6 + $0x1d0] ss:$8 sps:$4 sm:$0xff]   ;;  %v1294_v45 = vld [vmem:[#allocation6 + $0x1c4] ss:$8 sps:$4 sm:$0xff]   ;;  %v1296_v46 = vld [vmem:[#allocation6 + $0xc0] ss:$8 sps:$4 sm:$0xff]  }
  0x45   :  { %554 = vmatprep.subr.bf16.mxu1 %v1252_v17  ;;  %v1297_v47 = vld [vmem:[#allocation6 + $0x1c0] ss:$8 sps:$4 sm:$0xff]   ;;  %v1298_v48 = vld [vmem:[#allocation6 + $0xb4] ss:$8 sps:$4 sm:$0xff]   ;;  %v1302_v52 = vld [vmem:[#allocation6 + $0xb0] ss:$8 sps:$4 sm:$0xff]  }
  0x46   :  { %v1324_v49 = vld [vmem:[#allocation3 + $0x4] ss:$16 sps:$4 sm:$0xff]   ;;  %v1327_v51 = vld [vmem:[#allocation3 + $0xc] ss:$16 sps:$4 sm:$0xff]   ;;  %v1303_v53 = vld [vmem:[#allocation6 + $0x1b0] ss:$8 sps:$4 sm:$0xff]  }
  0x47   :  { %512 = vmatpush1.bf16.msra.mxu0 %v1254_v18  ;;  %v1300_v50 = vld [vmem:[#allocation6 + $0x1b4] ss:$8 sps:$4 sm:$0xff]   ;;  %535 = vmatprep.mubr.bf16.mxu0 %v1324_v49  ;;  %v1304_v54 = vld [vmem:[#allocation6 + $0xa4] ss:$8 sps:$4 sm:$0xff]   ;;  %v1308_v56 = vld [vmem:[#allocation6 + $0xa0] ss:$8 sps:$4 sm:$0xff]  }
  0x48   :  { %555 = vmatpush1.bf16.msra.mxu1 %v1255_v19  ;;  %513 = vmatprep.subr.bf16.mxu0 %v1256_v20  ;;  %v1306_v55 = vld [vmem:[#allocation6 + $0x1a4] ss:$8 sps:$4 sm:$0xff]   ;;  %v1309_v57 = vld [vmem:[#allocation6 + $0x1a0] ss:$8 sps:$4 sm:$0xff]   ;;  %v1310_v58 = vld [vmem:[#allocation6 + $0x94] ss:$8 sps:$4 sm:$0xff]  }
  0x49   :  { %556 = vmatprep.subr.bf16.mxu1 %v1258_v21  ;;  %578 = vmatprep.mubr.bf16.mxu1 %v1327_v51  ;;  %v1312_v59 = vld [vmem:[#allocation6 + $0x194] ss:$8 sps:$4 sm:$0xff]   ;;  %v1314_v60 = vld [vmem:[#allocation6 + $0x90] ss:$8 sps:$4 sm:$0xff]   ;;  %v1316_v62 = vld [vmem:[#allocation6 + $0x84] ss:$8 sps:$4 sm:$0xff]  }
  0x4a   :  { %v1315_v61 = vld [vmem:[#allocation6 + $0x190] ss:$8 sps:$4 sm:$0xff]   ;;  %v1318_v63 = vld [vmem:[#allocation6 + $0x184] ss:$8 sps:$4 sm:$0xff]   ;;  %v1320_v0 = vld [vmem:[#allocation6 + $0x80] ss:$8 sps:$4 sm:$0xff]  }
  0x4b   :  { %514 = vmatpush1.bf16.msra.mxu0 %v1260_v22  ;;  %v1321_v1 = vld [vmem:[#allocation6 + $0x180] ss:$8 sps:$4 sm:$0xff]   ;;  %v1330_v4 = vld [vmem:[#allocation8 + $0x74] ss:$8 sps:$4 sm:$0xff]   ;;  %v1328_v5 = vld [vmem:[#allocation8 + $0x70] ss:$8 sps:$4 sm:$0xff]  }
  0x4c   :  { %557 = vmatpush1.bf16.msra.mxu1 %v1261_v23  ;;  %515 = vmatprep.subr.bf16.mxu0 %v1262_v24  ;;  %v1322_v2 = vld [vmem:[#allocation3] ss:$16 sps:$4 sm:$0xff]   ;;  %v1325_v3 = vld [vmem:[#allocation3 + $0x8] ss:$16 sps:$4 sm:$0xff]   ;;  %v1333_v6 = vld [vmem:[#allocation8 + $0x64] ss:$8 sps:$4 sm:$0xff]  }
  0x4d   :  { %558 = vmatprep.subr.bf16.mxu1 %v1264_v25  ;;  %v1331_v7 = vld [vmem:[#allocation8 + $0x60] ss:$8 sps:$4 sm:$0xff]   ;;  %v1336_v8 = vld [vmem:[#allocation8 + $0x54] ss:$8 sps:$4 sm:$0xff]   ;;  %v1334_v9 = vld [vmem:[#allocation8 + $0x50] ss:$8 sps:$4 sm:$0xff]  }
  0x4e   :  { %v1339_v10 = vld [vmem:[#allocation8 + $0x44] ss:$8 sps:$4 sm:$0xff]   ;;  %v1337_v11 = vld [vmem:[#allocation8 + $0x40] ss:$8 sps:$4 sm:$0xff]   ;;  %v1342_v12 = vld [vmem:[#allocation8 + $0x34] ss:$8 sps:$4 sm:$0xff]  }
  0x4f   :  { %516 = vmatpush1.bf16.msra.mxu0 %v1266_v26  ;;  %v1340_v13 = vld [vmem:[#allocation8 + $0x30] ss:$8 sps:$4 sm:$0xff]   ;;  %v1345_v14 = vld [vmem:[#allocation8 + $0x24] ss:$8 sps:$4 sm:$0xff]   ;;  %v1343_v15 = vld [vmem:[#allocation8 + $0x20] ss:$8 sps:$4 sm:$0xff]  }
  0x50   :  { %559 = vmatpush1.bf16.msra.mxu1 %v1267_v27  ;;  %517 = vmatprep.subr.bf16.mxu0 %v1268_v28  ;;  %v1348_v16 = vld [vmem:[#allocation8 + $0x14] ss:$8 sps:$4 sm:$0xff]   ;;  %v1346_v17 = vld [vmem:[#allocation8 + $0x10] ss:$8 sps:$4 sm:$0xff]   ;;  %v1351_v18 = vld [vmem:[#allocation8 + $0x4] ss:$8 sps:$4 sm:$0xff]  }
  0x51   :  { %560 = vmatprep.subr.bf16.mxu1 %v1270_v29  ;;  %v1349_v19 = vld [vmem:[#allocation8] ss:$8 sps:$4 sm:$0xff]   ;;  %v1354_v20 = vld [vmem:[#allocation8 + $0xf4] ss:$8 sps:$4 sm:$0xff]   ;;  %v1352_v21 = vld [vmem:[#allocation8 + $0xf0] ss:$8 sps:$4 sm:$0xff]  }
  0x52   :  { %v1357_v22 = vld [vmem:[#allocation8 + $0xe4] ss:$8 sps:$4 sm:$0xff]   ;;  %v1355_v23 = vld [vmem:[#allocation8 + $0xe0] ss:$8 sps:$4 sm:$0xff]   ;;  %v1360_v24 = vld [vmem:[#allocation8 + $0xd4] ss:$8 sps:$4 sm:$0xff]  }
  0x53   :  { %518 = vmatpush1.bf16.msra.mxu0 %v1272_v30  ;;  %v1358_v25 = vld [vmem:[#allocation8 + $0xd0] ss:$8 sps:$4 sm:$0xff]   ;;  %v1363_v26 = vld [vmem:[#allocation8 + $0xc4] ss:$8 sps:$4 sm:$0xff]   ;;  %v1361_v27 = vld [vmem:[#allocation8 + $0xc0] ss:$8 sps:$4 sm:$0xff]  }
  0x54   :  { %561 = vmatpush1.bf16.msra.mxu1 %v1273_v31  ;;  %519 = vmatprep.subr.bf16.mxu0 %v1274_v32  ;;  %v1366_v28 = vld [vmem:[#allocation8 + $0xb4] ss:$8 sps:$4 sm:$0xff]   ;;  %v1364_v29 = vld [vmem:[#allocation8 + $0xb0] ss:$8 sps:$4 sm:$0xff]   ;;  %v1369_v30 = vld [vmem:[#allocation8 + $0xa4] ss:$8 sps:$4 sm:$0xff]  }
  0x55   :  { %562 = vmatprep.subr.bf16.mxu1 %v1276_v33  ;;  %v1367_v31 = vld [vmem:[#allocation8 + $0xa0] ss:$8 sps:$4 sm:$0xff]   ;;  %v1372_v32 = vld [vmem:[#allocation8 + $0x94] ss:$8 sps:$4 sm:$0xff]   ;;  %v1370_v33 = vld [vmem:[#allocation8 + $0x90] ss:$8 sps:$4 sm:$0xff]  }
  0x56   :  { %s1510_s29 = smov [#allocation11]  }
  0x57   :  { %520 = vmatpush2.bf16.msra.mxu0 %v1278_v34  ;;  %v1375_v34 = vld [vmem:[#allocation8 + $0x84] ss:$8 sps:$4 sm:$0xff]   ;;  %s1062_s30 = sshll.u32 %s1510_s29, 4  ;;  %s1063_s30 = int_to_ptr.vmem [resolvable:$true] %s1062_s30 }
  0x58   :  { %563 = vmatpush2.bf16.msra.mxu1 %v1279_v35  ;;  %521 = vmatprep.subr.bf16.mxu0 %v1280_v36  ;;  %v1373_v35 = vld [vmem:[#allocation8 + $0x80] ss:$8 sps:$4 sm:$0xff]   ;;  %v1376_v36 = vld [vmem:[#allocation9 + $0x78] sm:$0xff]   ;;  %s1472_s8 = scalar_lea.vmem %s1063_s30, 256  ;;  %p1477_p7 = scmp.lt.s32.totalorder %s1063_s30, %s1063_s30 }
  0x59   :  { %564 = vmatprep.subr.bf16.mxu1 %v1282_v37  ;;  %v1377_v37 = vld [vmem:[#allocation9 + $0x38] sm:$0xff]   ;;  %p1473_p6 = scmp.ne.s32.totalorder %s1063_s30, %s1472_s8  ;;  %p1478_p8 = scmp.lt.s32.totalorder %s1472_s8, %s1472_s8 }
  0x5b   :  { %522 = vmatpush2.bf16.msra.mxu0 %v1284_v38  ;;  %v1378_v38 = vld [vmem:[#allocation9 + $0x70] sm:$0xff]   ;;  %p1479_p9 = por %p1478_p8, %p1477_p7 }
  0x5c   :  { %565 = vmatpush2.bf16.msra.mxu1 %v1285_v39  ;;  %523 = vmatprep.subr.bf16.mxu0 %v1286_v40  ;;  %v1379_v39 = vld [vmem:[#allocation9 + $0x30] sm:$0xff]   ;;  %v1380_v40 = vld [vmem:[#allocation9 + $0x68] sm:$0xff]  }
  0x5d   :  { %566 = vmatprep.subr.bf16.mxu1 %v1288_v41  ;;  %v1381_v41 = vld [vmem:[#allocation9 + $0x28] sm:$0xff]   ;;  %p1480_p10 = pnand %p1479_p9, %p1473_p6 }
  0x5f   :  { %524 = vmatpush2.bf16.msra.mxu0 %v1290_v42  ;;  %v1382_v42 = vld [vmem:[#allocation9 + $0x60] sm:$0xff]  }
  0x60   :  { %567 = vmatpush2.bf16.msra.mxu1 %v1291_v43  ;;  %525 = vmatprep.subr.bf16.mxu0 %v1292_v44  ;;  %v1383_v43 = vld [vmem:[#allocation9 + $0x20] sm:$0xff]   ;;  %v1384_v44 = vld [vmem:[#allocation9 + $0x58] sm:$0xff]  }
  0x61   :  { %568 = vmatprep.subr.bf16.mxu1 %v1294_v45  ;;  %v1385_v45 = vld [vmem:[#allocation9 + $0x18] sm:$0xff]  }
  0x63   :  { %526 = vmatpush2.bf16.msra.mxu0 %v1296_v46  ;;  %v606_v46 = vlaneseq }
  0x64   :  { %569 = vmatpush2.bf16.msra.mxu1 %v1297_v47  ;;  %527 = vmatprep.subr.bf16.mxu0 %v1298_v48 }
  0x65   :  { %570 = vmatprep.subr.bf16.mxu1 %v1300_v50  ;;  %v607_v47 = vshrl.u32 %v606_v46, 7 }
  0x67   :  { %528 = vmatpush2.bf16.msra.mxu0 %v1302_v52  ;;  %v612_v48 = vsub.s32 1, %v607_v47  ;;  %v608_v51 = vsub.s32 0, %v607_v47  ;;  %v604_v52 = vld [vmem:[%s1586_s2] sm:$0x3] }
  0x68   :  { %571 = vmatpush2.bf16.msra.mxu1 %v1303_v53  ;;  %529 = vmatprep.subr.bf16.mxu0 %v1304_v54 }
  0x69   :  { %572 = vmatprep.subr.bf16.mxu1 %v1306_v55 }
  0x6b   :  { %530 = vmatpush2.bf16.msra.mxu0 %v1308_v56  ;;  %v613_v56 = vrot.slane %v604_v52, %v612_v48 }
  0x6c   :  { %573 = vmatpush2.bf16.msra.mxu1 %v1309_v57  ;;  %531 = vmatprep.subr.bf16.mxu0 %v1310_v58  ;;  %v609_v58 = vrot.slane %v604_v52, %v608_v51 }
  0x6d   :  { %574 = vmatprep.subr.bf16.mxu1 %v1312_v59 }
  0x6f   :  { %532 = vmatpush2.bf16.msra.mxu0 %v1314_v60 }
  0x70   :  { %575 = vmatpush2.bf16.msra.mxu1 %v1315_v61  ;;  %533 = vmatprep.subr.bf16.mxu0 %v1316_v62 }
  0x71   :  { %576 = vmatprep.subr.bf16.mxu1 %v1318_v63 }
  0x73   :  { %534 = vmatpush2.bf16.msra.mxu0 %v1320_v0 }
  0x74   :  { %577 = vmatpush2.bf16.msra.mxu1 %v1321_v1  ;;  %830 = vmatprep.subr.bf16.mxu0 %v1330_v4 }
  0x75   :  { %1193 = vmatprep.subr.bf16.mxu1 %v1376_v36 }
  0x76   :  { %536 = vmatmul.mubr.bf16.vlgmr.msra.gmra.mxu0 %v1322_v2 }
  0x77   :  { %579 = vmatmul.mubr.bf16.vlgmr.msra.gmra.mxu1 %v1325_v3  ;;  %831 = vmatpush1.bf16.msra.mxu0 %v1328_v5 }
  0x78   :  { %832 = vmatprep.subr.bf16.mxu0 %v1333_v6  ;;  %1194 = vmatpush3.bf16.msra.mxu1 %v1377_v37 }
  0x79   :  { %1195 = vmatprep.subr.bf16.mxu1 %v1378_v38 }
  0x7b   :  { %833 = vmatpush1.bf16.msra.mxu0 %v1331_v7 }
  0x7c   :  { %834 = vmatprep.subr.bf16.mxu0 %v1336_v8  ;;  %1196 = vmatpush3.bf16.msra.mxu1 %v1379_v39 }
  0x7d   :  { %1197 = vmatprep.subr.bf16.mxu1 %v1380_v40 }
  0x7f   :  { %835 = vmatpush1.bf16.msra.mxu0 %v1334_v9 }
  0x80   :  { %836 = vmatprep.subr.bf16.mxu0 %v1339_v10  ;;  %1198 = vmatpush3.bf16.msra.mxu1 %v1381_v41 }
  0x81   :  { %1199 = vmatprep.subr.bf16.mxu1 %v1382_v42 }
  0x83   :  { %837 = vmatpush1.bf16.msra.mxu0 %v1337_v11  ;;  %v1386_v11 = vld [vmem:[#allocation9 + $0x50] sm:$0xff]  }
  0x84   :  { %838 = vmatprep.subr.bf16.mxu0 %v1342_v12  ;;  %1200 = vmatpush3.bf16.msra.mxu1 %v1383_v43  ;;  %v1387_v12 = vld [vmem:[#allocation9 + $0x10] sm:$0xff]  }
  0x85   :  { %1201 = vmatprep.subr.bf16.mxu1 %v1384_v44 }
  0x87   :  { %839 = vmatpush1.bf16.msra.mxu0 %v1340_v13  ;;  %v1388_v13 = vld [vmem:[#allocation9 + $0x48] sm:$0xff]  }
  0x88   :  { %840 = vmatprep.subr.bf16.mxu0 %v1345_v14  ;;  %1202 = vmatpush3.bf16.msra.mxu1 %v1385_v45  ;;  %v1389_v14 = vld [vmem:[#allocation9 + $0x8] sm:$0xff]  }
  0x89   :  { %1203 = vmatprep.subr.bf16.mxu1 %v1386_v11 }
  0x8b   :  { %841 = vmatpush1.bf16.msra.mxu0 %v1343_v15  ;;  %v1390_v15 = vld [vmem:[#allocation9 + $0x40] sm:$0xff]  }
  0x8c   :  { %842 = vmatprep.subr.bf16.mxu0 %v1348_v16  ;;  %1204 = vmatpush3.bf16.msra.mxu1 %v1387_v12  ;;  %v1391_v16 = vld [vmem:[#allocation9] sm:$0xff]  }
  0x8d   :  { %1205 = vmatprep.subr.bf16.mxu1 %v1388_v13 }
  0x8f   :  { %843 = vmatpush1.bf16.msra.mxu0 %v1346_v17  ;;  %v658_v17 = vld [vmem:[%s1588_s4] sm:$0x3] }
  0x90   :  { %844 = vmatprep.subr.bf16.mxu0 %v1351_v18  ;;  %1206 = vmatpush3.bf16.msra.mxu1 %v1389_v14 }
  0x91   :  { %1207 = vmatprep.subr.bf16.mxu1 %v1390_v15 }
  0x93   :  { %845 = vmatpush1.bf16.msra.mxu0 %v1349_v19  ;;  %v667_v19 = vrot.slane %v658_v17, %v612_v48 }
  0x94   :  { %846 = vmatprep.subr.bf16.mxu0 %v1354_v20  ;;  %1208 = vmatpush3.bf16.msra.mxu1 %v1391_v16  ;;  %v663_v20 = vrot.slane %v658_v17, %v608_v51 }
  0x97   :  { %847 = vmatpush2.bf16.msra.mxu0 %v1352_v21 }
  0x98   :  { %848 = vmatprep.subr.bf16.mxu0 %v1357_v22 }
  0x9b   :  { %849 = vmatpush2.bf16.msra.mxu0 %v1355_v23 }
  0x9c   :  { %850 = vmatprep.subr.bf16.mxu0 %v1360_v24 }
  0x9f   :  { %851 = vmatpush2.bf16.msra.mxu0 %v1358_v25 }
  0xa0   :  { %852 = vmatprep.subr.bf16.mxu0 %v1363_v26 }
  0xa3   :  { %853 = vmatpush2.bf16.msra.mxu0 %v1361_v27 }
  0xa4   :  { %854 = vmatprep.subr.bf16.mxu0 %v1366_v28 }
  0xa7   :  { %855 = vmatpush2.bf16.msra.mxu0 %v1364_v29 }
  0xa8   :  { %856 = vmatprep.subr.bf16.mxu0 %v1369_v30 }
  0xab   :  { %857 = vmatpush2.bf16.msra.mxu0 %v1367_v31 }
  0xac   :  { %858 = vmatprep.subr.bf16.mxu0 %v1372_v32 }
  0xaf   :  { %859 = vmatpush2.bf16.msra.mxu0 %v1370_v33 }
  0xb0   :  { %860 = vmatprep.subr.bf16.mxu0 %v1375_v34 }
  0xb3   :  { %861 = vmatpush2.bf16.msra.mxu0 %v1373_v35  ;;  %v1176_v35 = vld [vmem:[%s1590_s6] ss:$0 sm:$0xff] }
 0x136   :  { %v537_v49 = vpop.f32.mrf.mxu0 }
 0x137   :  { %v580_v50 = vpop.f32.mrf.mxu1 }
 0x138   :  { %v539_v53 = vpop.f32.mrf.mxu0  ;;  %v581_v57 = vadd.f32 %v580_v50, %v537_v49 }
 0x139   :  { %v582_v54 = vpop.f32.mrf.mxu1 }
 0x13a   :  { %v583_v55 = vadd.f32 %v582_v54, %v539_v53  ;;  %v541_v59 = vpop.f32.mrf.mxu0  ;;  %v616_v3 = vadd.f32 %v609_v58, %v581_v57 }
 0x13b   :  { %v584_v60 = vpop.f32.mrf.mxu1 }
 0x13c   :  { %v585_v61 = vadd.f32 %v584_v60, %v541_v59  ;;  %v543_v62 = vpop.f32.mrf.mxu0  ;;  %v617_v0 = vadd.f32 %v613_v56, %v583_v55  ;;  %v620_v8 = vmax.f32 %v616_v3, 0.0 }
 0x13d   :  { %v586_v63 = vpop.f32.mrf.mxu1 }
 0x13e   :  { %v618_v1 = vadd.f32 %v609_v58, %v585_v61  ;;  %v587_v2 = vadd.f32 %v586_v63, %v543_v62  ;;  %v621_v6 = vmax.f32 %v617_v0, 0.0 }
 0x140   :  { %v619_v4 = vadd.f32 %v613_v56, %v587_v2  ;;  %v622_v5 = vmax.f32 %v618_v1, 0.0 }
 0x142   :  { %v623_v7 = vmax.f32 %v619_v4, 0.0  ;;  %v624_v10 = vpack.c.bf16 %v622_v5, %v620_v8 }
 0x144   :  { %v625_v9 = vpack.c.bf16 %v623_v7, %v621_v6 }
 0x146   :  { %862 = vmatprep.mubr.bf16.mxu0 %v625_v9 }
 0x147   :  { %863 = vmatmul.mubr.bf16.vlgmr.msra.gmra.mxu0 %v624_v10 }
 0x207   :  { %v864_v18 = vpop.f32.mrf.mxu0 }
 0x208   :  { %v865_v25 = vadd.f32 %v864_v18, %v663_v20 }
 0x209   :  { %v866_v21 = vpop.f32.mrf.mxu0 }
 0x20a   :  { %v867_v23 = vadd.f32 %v866_v21, %v667_v19  ;;  %v873_v31 = vmax.f32 %v865_v25, 0.0 }
 0x20b   :  { %v868_v22 = vpop.f32.mrf.mxu0 }
 0x20c   :  { %v869_v24 = vadd.f32 %v868_v22, %v663_v20  ;;  %v874_v29 = vmax.f32 %v867_v23, 0.0 }
 0x20d   :  { %v870_v26 = vpop.f32.mrf.mxu0 }
 0x20e   :  { %v871_v27 = vadd.f32 %v870_v26, %v667_v19  ;;  %v875_v28 = vmax.f32 %v869_v24, 0.0 }
 0x210   :  { %v876_v30 = vmax.f32 %v871_v27, 0.0  ;;  %v877_v33 = vpack.c.bf16 %v875_v28, %v873_v31 }
 0x212   :  { %v878_v32 = vpack.c.bf16 %v876_v30, %v874_v29 }
 0x214   :  { %1046 = vmatprep.mubr.bf16.mxu1 %v878_v32 }
 0x215   :  { %1047 = vmatmul.mubr.bf16.vlgmr.msra.gmra.mxu1 %v877_v33 }
 0x2d5   :  { %v1209_v34 = vpop.f32.mrf.mxu1 }
 0x2d7   :  { %v1210_v36 = vpop.f32.mrf.mxu1 }
 0x2d8   :  { %v1211_v37 = vadd.f32 %v1210_v36, %v1209_v34 }
 0x2d9   :  { %v1212_v38 = vpop.f32.mrf.mxu1 }
 0x2da   :  { %v1049_v39 = vadd.f32 %v1211_v37, %v1176_v35 }
 0x2db   :  { %v1213_v40 = vpop.f32.mrf.mxu1 }
 0x2dc   :  { %1055 = vst [vmem:[#allocation11] sm:$0xff] %v1049_v39  ;;  %v1214_v41 = vadd.f32 %v1213_v40, %v1212_v38 }
 0x2de   :  { %v1052_v42 = vadd.f32 %v1214_v41, %v1176_v35 }
 0x2e0   :  { %1056 = vst [vmem:[#allocation11 + $0x8] sm:$0xff] %v1052_v42 }
 0x2e1   :  { %1483 = shalt.err (!%p1480_p10)
}
 0x2e2   :  { %1068 = dma.vmem_to_hbm [thread:$0]  %s1063_s30, 256, %s1591_s7, [#allocation5], %s1501_s27, %s1501_s27, %s1502_s28  }
 0x2e3   :  { %1498 = dma.done.wait [#allocation5], 256  }
 0x2e4   :  { %1499 = vsyncadd [#allocation5], 4294967040 }
 0x2e5   :  { %1072 = vsyncpa [#allocation4], 1 }
 0x2e6   :  { %1073 = vsyncpa [#allocation7], 1 }
 0x2e7   :  { %1074 = vsyncpa [#allocation10], 1 }
 0x2e8   :  { %1075 = vsyncpa [#allocation5], 1 }

</bundles_post_ra>
